<compile_context>
chip_gen: v7x
topology: tpu7x:2x2x1
jax: 0.10.0
libtpu: 0.0.40
codegen_flags: <defaults>
</compile_context>

<pallas_src>
import jax
import jax.numpy as jnp
from jax.experimental import pallas as pl
from jax.experimental.pallas import tpu as pltpu

# ---- small shapes consistent with the module ----
B, S = 4, 8                    # batch, max sequence length
BP = 8                         # batch padded to a sublane multiple (8)
E, H, L, V = 16, 32, 8, 128    # embed_size, hidden_size, latent_size, vocab
PAD, SOS, EOS, UNK = 0, 1, 2, 3
WORD_DROPOUT = 0.2


def make_kernel(seq_len, bp):
    def kernel(emb_ref, len_ref, z_ref,
               wl_ref, bl_ref,
               wihr_ref, wihz_ref, wihn_ref,
               bihr_ref, bihz_ref, bihn_ref,
               whhr_ref, whhz_ref, whhn_ref,
               bhhn_ref,
               wout_ref, bout_ref,
               out_ref):
        emb = emb_ref[...]                                           # (S*BP, E)

        # ---- hoisted input-to-hidden projections, one lane-0-aligned tensor
        # per gate.  bhh[r], bhh[z] are already folded into bih_r / bih_z.
        gx_r = jnp.dot(emb, wihr_ref[...],
                       preferred_element_type=jnp.float32) + bihr_ref[...]
        gx_z = jnp.dot(emb, wihz_ref[...],
                       preferred_element_type=jnp.float32) + bihz_ref[...]
        gx_n = jnp.dot(emb, wihn_ref[...],
                       preferred_element_type=jnp.float32) + bihn_ref[...]

        # latent2hidden: h0 = z @ Wl^T + bl
        h = jnp.dot(z_ref[...], wl_ref[...],
                    preferred_element_type=jnp.float32) + bl_ref[...]

        whh_r = whhr_ref[...]
        whh_z = whhz_ref[...]
        whh_n = whhn_ref[...]
        bhh_n = bhhn_ref[...]
        len_col = len_ref[...]                                       # (BP, 1) i32

        # ---- fully unrolled static recurrence; no scratch stores/loads.
        hs = []
        for t in range(seq_len):
            lo = t * bp
            gh_r = jnp.dot(h, whh_r, preferred_element_type=jnp.float32)
            gh_z = jnp.dot(h, whh_z, preferred_element_type=jnp.float32)
            gh_n = jnp.dot(h, whh_n, preferred_element_type=jnp.float32)
            # PyTorch GRU gate order: r, z, n
            r = jax.nn.sigmoid(gx_r[lo:lo + bp, :] + gh_r)
            zg = jax.nn.sigmoid(gx_z[lo:lo + bp, :] + gh_z)
            n = jnp.tanh(gx_n[lo:lo + bp, :] + r * (gh_n + bhh_n))
            h = (1.0 - zg) * n + zg * h
            # pad_packed_sequence semantics: zero outputs where t >= length
            hs.append(jnp.where(len_col > t, h, 0.0))

        h_all = jnp.concatenate(hs, axis=0)                          # (S*BP, H)

        # ---- batched epilogue: outputs2vocab + log_softmax, one lane-dense
        # (S*BP, 128) unmasked store.
        logits = jnp.dot(h_all, wout_ref[...],
                         preferred_element_type=jnp.float32) + bout_ref[...]
        m = jnp.max(logits, axis=-1, keepdims=True)
        shifted = logits - m
        lse = jnp.log(jnp.sum(jnp.exp(shifted), axis=-1, keepdims=True))
        out_ref[...] = shifted - lse

    return kernel


def preprocess_params(params):
    """One-time parameter prep (transposes, per-gate split, bias folds).

    Kept out of the per-call hot path so the ~µs kernel is not dominated by
    XLA transpose/concat dispatch overhead.
    """
    (_, Wl, bl, Wih, bih, Whh, bhh, Wout, bout) = params
    wih_r, wih_z, wih_n = Wih[:H].T, Wih[H:2 * H].T, Wih[2 * H:].T    # (E, H)
    whh_r, whh_z, whh_n = Whh[:H].T, Whh[H:2 * H].T, Whh[2 * H:].T    # (H, H)
    # fold bhh[r], bhh[z] into bih (exact); only bhh[n] stays per step
    bih_r = (bih[:H] + bhh[:H]).reshape(1, H)
    bih_z = (bih[H:2 * H] + bhh[H:2 * H]).reshape(1, H)
    bih_n = bih[2 * H:].reshape(1, H)
    bhh_n = bhh[2 * H:].reshape(1, H)
    return (Wl.T, bl.reshape(1, H),
            wih_r, wih_z, wih_n,
            bih_r, bih_z, bih_n,
            whh_r, whh_z, whh_n,
            bhh_n,
            Wout.T, bout.reshape(1, V))


def embed_with_word_dropout(tokens, emb_table, drop_key):
    # mirrors the torch forward's word-dropout block (deterministic PRNG here)
    prob = jax.random.uniform(drop_key, tokens.shape)
    keep = ((tokens - SOS) * (tokens - PAD)) == 0
    prob = jnp.where(keep, 1.0, prob)
    dec_in = jnp.where(prob < WORD_DROPOUT, UNK, tokens)
    emb = emb_table[dec_in]                  # (B, S, E)
    # embedding_dropout: nn.Dropout in eval mode -> identity
    return emb


@jax.jit
def sentence_decoder_forward(emb, lengths, z, prepped):
    (wl_t, bl2,
     wih_r, wih_z, wih_n,
     bih_r, bih_z, bih_n,
     whh_r, whh_z, whh_n,
     bhh_n,
     wout_t, bout2) = prepped

    # time-major, batch padded to BP, flattened to (S*BP, E)
    emb_p = jnp.pad(emb, ((0, BP - B), (0, 0), (0, 0)))
    emb_flat = jnp.transpose(emb_p, (1, 0, 2)).reshape(S * BP, E)
    z_p = jnp.pad(z, ((0, BP - B), (0, 0)))
    len_col = jnp.pad(lengths.astype(jnp.int32), (0, BP - B)).reshape(BP, 1)

    vmem = lambda: pl.BlockSpec(memory_space=pltpu.MemorySpace.VMEM)
    out_flat = pl.pallas_call(
        make_kernel(S, BP),
        out_shape=jax.ShapeDtypeStruct((S * BP, V), jnp.float32),
        in_specs=[vmem() for _ in range(17)],
        out_specs=vmem(),
    )(emb_flat, len_col, z_p,
      wl_t, bl2,
      wih_r, wih_z, wih_n,
      bih_r, bih_z, bih_n,
      whh_r, whh_z, whh_n,
      bhh_n,
      wout_t, bout2)

    out = out_flat.reshape(S, BP, V)[:, :B, :]        # drop batch padding
    return jnp.transpose(out, (1, 0, 2))              # (B, S, V), batch_first


def ref_forward(emb, lengths, z, params):
    (_, Wl, bl, Wih, bih, Whh, bhh, Wout, bout) = params
    h = z @ Wl.T + bl
    outs = []
    for t in range(S):
        x = emb[:, t, :]
        gx = x @ Wih.T + bih
        gh = h @ Whh.T + bhh
        r = jax.nn.sigmoid(gx[:, :H] + gh[:, :H])
        zg = jax.nn.sigmoid(gx[:, H:2 * H] + gh[:, H:2 * H])
        n = jnp.tanh(gx[:, 2 * H:] + r * gh[:, 2 * H:])
        h = (1.0 - zg) * n + zg * h
        outs.append(jnp.where(lengths[:, None] > t, h, 0.0))
    hs = jnp.stack(outs, axis=1)             # (B, S, H)
    logits = hs @ Wout.T + bout
    return jax.nn.log_softmax(logits, axis=-1)


if __name__ == "__main__":
    key = jax.random.PRNGKey(0)
    ks = jax.random.split(key, 12)

    # deterministic synthetic parameters (PyTorch Linear/GRU weight shapes)
    emb_table = 0.1 * jax.random.normal(ks[0], (V, E), jnp.float32)
    Wl = 0.1 * jax.random.normal(ks[1], (H, L), jnp.float32)          # latent2hidden
    bl = 0.1 * jax.random.normal(ks[2], (H,), jnp.float32)
    Wih = 0.1 * jax.random.normal(ks[3], (3 * H, E), jnp.float32)     # GRU weight_ih_l0
    bih = 0.1 * jax.random.normal(ks[4], (3 * H,), jnp.float32)
    Whh = 0.1 * jax.random.normal(ks[5], (3 * H, H), jnp.float32)     # GRU weight_hh_l0
    bhh = 0.1 * jax.random.normal(ks[6], (3 * H,), jnp.float32)
    Wout = 0.1 * jax.random.normal(ks[7], (V, H), jnp.float32)        # outputs2vocab
    bout = 0.1 * jax.random.normal(ks[8], (V,), jnp.float32)
    params = (emb_table, Wl, bl, Wih, bih, Whh, bhh, Wout, bout)
    prepped = preprocess_params(params)      # one-time, outside the hot path

    # inputs: token ids (B, S), lengths (B,), latent z (B, L)
    lengths = jnp.array([8, 6, 5, 3], jnp.int32)   # max == S so pad_packed keeps S
    tokens = jax.random.randint(ks[9], (B, S), 4, V)
    tokens = tokens.at[:, 0].set(SOS)
    tokens = jnp.where(jnp.arange(S)[None, :] < lengths[:, None], tokens, PAD)
    z = jax.random.normal(ks[10], (B, L), jnp.float32)

    emb = embed_with_word_dropout(tokens, emb_table, ks[11])

    logp = sentence_decoder_forward(emb, lengths, z, prepped)
    logp = jax.block_until_ready(logp)

    ref = ref_forward(emb, lengths, z, params)
    assert logp.shape == (B, S, V)
    assert jnp.allclose(logp, ref, atol=3e-5, rtol=1e-5)
    print("KERNEL_OK")
</pallas_src>

<mosaic_0001>
module attributes {stable_mosaic.version = 11 : i64} {
  func.func @kernel(%arg0: memref<64x16xf32, #tpu.memory_space<vmem>>, %arg1: memref<8x1xi32, #tpu.memory_space<vmem>>, %arg2: memref<8x8xf32, #tpu.memory_space<vmem>>, %arg3: memref<8x32xf32, #tpu.memory_space<vmem>>, %arg4: memref<1x32xf32, #tpu.memory_space<vmem>>, %arg5: memref<16x32xf32, #tpu.memory_space<vmem>>, %arg6: memref<16x32xf32, #tpu.memory_space<vmem>>, %arg7: memref<16x32xf32, #tpu.memory_space<vmem>>, %arg8: memref<1x32xf32, #tpu.memory_space<vmem>>, %arg9: memref<1x32xf32, #tpu.memory_space<vmem>>, %arg10: memref<1x32xf32, #tpu.memory_space<vmem>>, %arg11: memref<32x32xf32, #tpu.memory_space<vmem>>, %arg12: memref<32x32xf32, #tpu.memory_space<vmem>>, %arg13: memref<32x32xf32, #tpu.memory_space<vmem>>, %arg14: memref<1x32xf32, #tpu.memory_space<vmem>>, %arg15: memref<32x128xf32, #tpu.memory_space<vmem>>, %arg16: memref<1x128xf32, #tpu.memory_space<vmem>>, %arg17: memref<64x128xf32, #tpu.memory_space<vmem>>) attributes {dimension_semantics = [], scalar_prefetch = 0 : i64, scratch_operands = 0 : i64, tpu.core_type = #tpu.core_type<tc>} {
    %c0 = arith.constant 0 : index
    %c0_0 = arith.constant 0 : index
    %0 = vector.load %arg0[%c0, %c0_0] : memref<64x16xf32, #tpu.memory_space<vmem>>, vector<64x16xf32>
    %c0_1 = arith.constant 0 : index
    %c0_2 = arith.constant 0 : index
    %1 = vector.load %arg5[%c0_1, %c0_2] : memref<16x32xf32, #tpu.memory_space<vmem>>, vector<16x32xf32>
    %cst = arith.constant dense<0.000000e+00> : vector<64x32xf32>
    %2 = tpu.matmul %0, %1, %cst {dimension_numbers = #tpu.dot_dimension_numbers<[1], [0], [0], [1], [0, 0, 1, 1], [], []>} : vector<64x16xf32>, vector<16x32xf32>, vector<64x32xf32> -> vector<64x32xf32>
    %c0_3 = arith.constant 0 : index
    %c0_4 = arith.constant 0 : index
    %3 = vector.load %arg8[%c0_3, %c0_4] : memref<1x32xf32, #tpu.memory_space<vmem>>, vector<1x32xf32>
    %4 = vector.broadcast %3 : vector<1x32xf32> to vector<64x32xf32>
    %5 = arith.addf %2, %4 : vector<64x32xf32>
    %c0_5 = arith.constant 0 : index
    %c0_6 = arith.constant 0 : index
    %6 = vector.load %arg6[%c0_5, %c0_6] : memref<16x32xf32, #tpu.memory_space<vmem>>, vector<16x32xf32>
    %cst_7 = arith.constant dense<0.000000e+00> : vector<64x32xf32>
    %7 = tpu.matmul %0, %6, %cst_7 {dimension_numbers = #tpu.dot_dimension_numbers<[1], [0], [0], [1], [0, 0, 1, 1], [], []>} : vector<64x16xf32>, vector<16x32xf32>, vector<64x32xf32> -> vector<64x32xf32>
    %c0_8 = arith.constant 0 : index
    %c0_9 = arith.constant 0 : index
    %8 = vector.load %arg9[%c0_8, %c0_9] : memref<1x32xf32, #tpu.memory_space<vmem>>, vector<1x32xf32>
    %9 = vector.broadcast %8 : vector<1x32xf32> to vector<64x32xf32>
    %10 = arith.addf %7, %9 : vector<64x32xf32>
    %c0_10 = arith.constant 0 : index
    %c0_11 = arith.constant 0 : index
    %11 = vector.load %arg7[%c0_10, %c0_11] : memref<16x32xf32, #tpu.memory_space<vmem>>, vector<16x32xf32>
    %cst_12 = arith.constant dense<0.000000e+00> : vector<64x32xf32>
    %12 = tpu.matmul %0, %11, %cst_12 {dimension_numbers = #tpu.dot_dimension_numbers<[1], [0], [0], [1], [0, 0, 1, 1], [], []>} : vector<64x16xf32>, vector<16x32xf32>, vector<64x32xf32> -> vector<64x32xf32>
    %c0_13 = arith.constant 0 : index
    %c0_14 = arith.constant 0 : index
    %13 = vector.load %arg10[%c0_13, %c0_14] : memref<1x32xf32, #tpu.memory_space<vmem>>, vector<1x32xf32>
    %14 = vector.broadcast %13 : vector<1x32xf32> to vector<64x32xf32>
    %15 = arith.addf %12, %14 : vector<64x32xf32>
    %c0_15 = arith.constant 0 : index
    %c0_16 = arith.constant 0 : index
    %16 = vector.load %arg2[%c0_15, %c0_16] : memref<8x8xf32, #tpu.memory_space<vmem>>, vector<8x8xf32>
    %c0_17 = arith.constant 0 : index
    %c0_18 = arith.constant 0 : index
    %17 = vector.load %arg3[%c0_17, %c0_18] : memref<8x32xf32, #tpu.memory_space<vmem>>, vector<8x32xf32>
    %cst_19 = arith.constant dense<0.000000e+00> : vector<8x32xf32>
    %18 = tpu.matmul %16, %17, %cst_19 {dimension_numbers = #tpu.dot_dimension_numbers<[1], [0], [0], [1], [0, 0, 1, 1], [], []>} : vector<8x8xf32>, vector<8x32xf32>, vector<8x32xf32> -> vector<8x32xf32>
    %c0_20 = arith.constant 0 : index
    %c0_21 = arith.constant 0 : index
    %19 = vector.load %arg4[%c0_20, %c0_21] : memref<1x32xf32, #tpu.memory_space<vmem>>, vector<1x32xf32>
    %20 = vector.broadcast %19 : vector<1x32xf32> to vector<8x32xf32>
    %21 = arith.addf %18, %20 : vector<8x32xf32>
    %c0_22 = arith.constant 0 : index
    %c0_23 = arith.constant 0 : index
    %22 = vector.load %arg11[%c0_22, %c0_23] : memref<32x32xf32, #tpu.memory_space<vmem>>, vector<32x32xf32>
    %c0_24 = arith.constant 0 : index
    %c0_25 = arith.constant 0 : index
    %23 = vector.load %arg12[%c0_24, %c0_25] : memref<32x32xf32, #tpu.memory_space<vmem>>, vector<32x32xf32>
    %c0_26 = arith.constant 0 : index
    %c0_27 = arith.constant 0 : index
    %24 = vector.load %arg13[%c0_26, %c0_27] : memref<32x32xf32, #tpu.memory_space<vmem>>, vector<32x32xf32>
    %c0_28 = arith.constant 0 : index
    %c0_29 = arith.constant 0 : index
    %25 = vector.load %arg14[%c0_28, %c0_29] : memref<1x32xf32, #tpu.memory_space<vmem>>, vector<1x32xf32>
    %c0_30 = arith.constant 0 : index
    %c0_31 = arith.constant 0 : index
    %26 = vector.load %arg1[%c0_30, %c0_31] : memref<8x1xi32, #tpu.memory_space<vmem>>, vector<8x1xi32>
    %cst_32 = arith.constant dense<0.000000e+00> : vector<8x32xf32>
    %27 = tpu.matmul %21, %22, %cst_32 {dimension_numbers = #tpu.dot_dimension_numbers<[1], [0], [0], [1], [0, 0, 1, 1], [], []>} : vector<8x32xf32>, vector<32x32xf32>, vector<8x32xf32> -> vector<8x32xf32>
    %cst_33 = arith.constant dense<0.000000e+00> : vector<8x32xf32>
    %28 = tpu.matmul %21, %23, %cst_33 {dimension_numbers = #tpu.dot_dimension_numbers<[1], [0], [0], [1], [0, 0, 1, 1], [], []>} : vector<8x32xf32>, vector<32x32xf32>, vector<8x32xf32> -> vector<8x32xf32>
    %cst_34 = arith.constant dense<0.000000e+00> : vector<8x32xf32>
    %29 = tpu.matmul %21, %24, %cst_34 {dimension_numbers = #tpu.dot_dimension_numbers<[1], [0], [0], [1], [0, 0, 1, 1], [], []>} : vector<8x32xf32>, vector<32x32xf32>, vector<8x32xf32> -> vector<8x32xf32>
    %30 = vector.extract_strided_slice %5 {offsets = [0, 0], sizes = [8, 32], strides = [1, 1]} : vector<64x32xf32> to vector<8x32xf32>
    %31 = arith.addf %30, %27 : vector<8x32xf32>
    %32 = arith.negf %31 : vector<8x32xf32>
    %33 = math.exp %32 : vector<8x32xf32>
    %cst_35 = arith.constant 1.000000e+00 : f32
    %34 = vector.broadcast %cst_35 : f32 to vector<8x32xf32>
    %35 = arith.addf %34, %33 : vector<8x32xf32>
    %36 = arith.divf %34, %35 : vector<8x32xf32>
    %37 = vector.extract_strided_slice %10 {offsets = [0, 0], sizes = [8, 32], strides = [1, 1]} : vector<64x32xf32> to vector<8x32xf32>
    %38 = arith.addf %37, %28 : vector<8x32xf32>
    %39 = arith.negf %38 : vector<8x32xf32>
    %40 = math.exp %39 : vector<8x32xf32>
    %cst_36 = arith.constant 1.000000e+00 : f32
    %41 = vector.broadcast %cst_36 : f32 to vector<8x32xf32>
    %42 = arith.addf %41, %40 : vector<8x32xf32>
    %43 = arith.divf %41, %42 : vector<8x32xf32>
    %44 = vector.extract_strided_slice %15 {offsets = [0, 0], sizes = [8, 32], strides = [1, 1]} : vector<64x32xf32> to vector<8x32xf32>
    %45 = vector.broadcast %25 : vector<1x32xf32> to vector<8x32xf32>
    %46 = arith.addf %29, %45 : vector<8x32xf32>
    %47 = arith.mulf %36, %46 : vector<8x32xf32>
    %48 = arith.addf %44, %47 : vector<8x32xf32>
    %49 = math.tanh %48 : vector<8x32xf32>
    %cst_37 = arith.constant 1.000000e+00 : f32
    %50 = vector.broadcast %cst_37 : f32 to vector<8x32xf32>
    %51 = arith.subf %50, %43 : vector<8x32xf32>
    %52 = arith.mulf %51, %49 : vector<8x32xf32>
    %53 = arith.mulf %43, %21 : vector<8x32xf32>
    %54 = arith.addf %52, %53 : vector<8x32xf32>
    %c0_i32 = arith.constant 0 : i32
    %55 = vector.broadcast %c0_i32 : i32 to vector<8x1xi32>
    %56 = arith.cmpi sgt, %26, %55 : vector<8x1xi32>
    %cst_38 = arith.constant 0.000000e+00 : f32
    %57 = vector.shape_cast %56 : vector<8x1xi1> to vector<8x1xi1>
    %58 = vector.broadcast %57 : vector<8x1xi1> to vector<8x32xi1>
    %59 = vector.broadcast %cst_38 : f32 to vector<8x32xf32>
    %60 = arith.select %58, %54, %59 : vector<8x32xi1>, vector<8x32xf32>
    %cst_39 = arith.constant dense<0.000000e+00> : vector<8x32xf32>
    %61 = tpu.matmul %54, %22, %cst_39 {dimension_numbers = #tpu.dot_dimension_numbers<[1], [0], [0], [1], [0, 0, 1, 1], [], []>} : vector<8x32xf32>, vector<32x32xf32>, vector<8x32xf32> -> vector<8x32xf32>
    %cst_40 = arith.constant dense<0.000000e+00> : vector<8x32xf32>
    %62 = tpu.matmul %54, %23, %cst_40 {dimension_numbers = #tpu.dot_dimension_numbers<[1], [0], [0], [1], [0, 0, 1, 1], [], []>} : vector<8x32xf32>, vector<32x32xf32>, vector<8x32xf32> -> vector<8x32xf32>
    %cst_41 = arith.constant dense<0.000000e+00> : vector<8x32xf32>
    %63 = tpu.matmul %54, %24, %cst_41 {dimension_numbers = #tpu.dot_dimension_numbers<[1], [0], [0], [1], [0, 0, 1, 1], [], []>} : vector<8x32xf32>, vector<32x32xf32>, vector<8x32xf32> -> vector<8x32xf32>
    %64 = vector.extract_strided_slice %5 {offsets = [8, 0], sizes = [8, 32], strides = [1, 1]} : vector<64x32xf32> to vector<8x32xf32>
    %65 = arith.addf %64, %61 : vector<8x32xf32>
    %66 = arith.negf %65 : vector<8x32xf32>
    %67 = math.exp %66 : vector<8x32xf32>
    %cst_42 = arith.constant 1.000000e+00 : f32
    %68 = vector.broadcast %cst_42 : f32 to vector<8x32xf32>
    %69 = arith.addf %68, %67 : vector<8x32xf32>
    %70 = arith.divf %68, %69 : vector<8x32xf32>
    %71 = vector.extract_strided_slice %10 {offsets = [8, 0], sizes = [8, 32], strides = [1, 1]} : vector<64x32xf32> to vector<8x32xf32>
    %72 = arith.addf %71, %62 : vector<8x32xf32>
    %73 = arith.negf %72 : vector<8x32xf32>
    %74 = math.exp %73 : vector<8x32xf32>
    %cst_43 = arith.constant 1.000000e+00 : f32
    %75 = vector.broadcast %cst_43 : f32 to vector<8x32xf32>
    %76 = arith.addf %75, %74 : vector<8x32xf32>
    %77 = arith.divf %75, %76 : vector<8x32xf32>
    %78 = vector.extract_strided_slice %15 {offsets = [8, 0], sizes = [8, 32], strides = [1, 1]} : vector<64x32xf32> to vector<8x32xf32>
    %79 = vector.broadcast %25 : vector<1x32xf32> to vector<8x32xf32>
    %80 = arith.addf %63, %79 : vector<8x32xf32>
    %81 = arith.mulf %70, %80 : vector<8x32xf32>
    %82 = arith.addf %78, %81 : vector<8x32xf32>
    %83 = math.tanh %82 : vector<8x32xf32>
    %cst_44 = arith.constant 1.000000e+00 : f32
    %84 = vector.broadcast %cst_44 : f32 to vector<8x32xf32>
    %85 = arith.subf %84, %77 : vector<8x32xf32>
    %86 = arith.mulf %85, %83 : vector<8x32xf32>
    %87 = arith.mulf %77, %54 : vector<8x32xf32>
    %88 = arith.addf %86, %87 : vector<8x32xf32>
    %c1_i32 = arith.constant 1 : i32
    %89 = vector.broadcast %c1_i32 : i32 to vector<8x1xi32>
    %90 = arith.cmpi sgt, %26, %89 : vector<8x1xi32>
    %cst_45 = arith.constant 0.000000e+00 : f32
    %91 = vector.shape_cast %90 : vector<8x1xi1> to vector<8x1xi1>
    %92 = vector.broadcast %91 : vector<8x1xi1> to vector<8x32xi1>
    %93 = vector.broadcast %cst_45 : f32 to vector<8x32xf32>
    %94 = arith.select %92, %88, %93 : vector<8x32xi1>, vector<8x32xf32>
    %cst_46 = arith.constant dense<0.000000e+00> : vector<8x32xf32>
    %95 = tpu.matmul %88, %22, %cst_46 {dimension_numbers = #tpu.dot_dimension_numbers<[1], [0], [0], [1], [0, 0, 1, 1], [], []>} : vector<8x32xf32>, vector<32x32xf32>, vector<8x32xf32> -> vector<8x32xf32>
    %cst_47 = arith.constant dense<0.000000e+00> : vector<8x32xf32>
    %96 = tpu.matmul %88, %23, %cst_47 {dimension_numbers = #tpu.dot_dimension_numbers<[1], [0], [0], [1], [0, 0, 1, 1], [], []>} : vector<8x32xf32>, vector<32x32xf32>, vector<8x32xf32> -> vector<8x32xf32>
    %cst_48 = arith.constant dense<0.000000e+00> : vector<8x32xf32>
    %97 = tpu.matmul %88, %24, %cst_48 {dimension_numbers = #tpu.dot_dimension_numbers<[1], [0], [0], [1], [0, 0, 1, 1], [], []>} : vector<8x32xf32>, vector<32x32xf32>, vector<8x32xf32> -> vector<8x32xf32>
    %98 = vector.extract_strided_slice %5 {offsets = [16, 0], sizes = [8, 32], strides = [1, 1]} : vector<64x32xf32> to vector<8x32xf32>
    %99 = arith.addf %98, %95 : vector<8x32xf32>
    %100 = arith.negf %99 : vector<8x32xf32>
    %101 = math.exp %100 : vector<8x32xf32>
    %cst_49 = arith.constant 1.000000e+00 : f32
    %102 = vector.broadcast %cst_49 : f32 to vector<8x32xf32>
    %103 = arith.addf %102, %101 : vector<8x32xf32>
    %104 = arith.divf %102, %103 : vector<8x32xf32>
    %105 = vector.extract_strided_slice %10 {offsets = [16, 0], sizes = [8, 32], strides = [1, 1]} : vector<64x32xf32> to vector<8x32xf32>
    %106 = arith.addf %105, %96 : vector<8x32xf32>
    %107 = arith.negf %106 : vector<8x32xf32>
    %108 = math.exp %107 : vector<8x32xf32>
    %cst_50 = arith.constant 1.000000e+00 : f32
    %109 = vector.broadcast %cst_50 : f32 to vector<8x32xf32>
    %110 = arith.addf %109, %108 : vector<8x32xf32>
    %111 = arith.divf %109, %110 : vector<8x32xf32>
    %112 = vector.extract_strided_slice %15 {offsets = [16, 0], sizes = [8, 32], strides = [1, 1]} : vector<64x32xf32> to vector<8x32xf32>
    %113 = vector.broadcast %25 : vector<1x32xf32> to vector<8x32xf32>
    %114 = arith.addf %97, %113 : vector<8x32xf32>
    %115 = arith.mulf %104, %114 : vector<8x32xf32>
    %116 = arith.addf %112, %115 : vector<8x32xf32>
    %117 = math.tanh %116 : vector<8x32xf32>
    %cst_51 = arith.constant 1.000000e+00 : f32
    %118 = vector.broadcast %cst_51 : f32 to vector<8x32xf32>
    %119 = arith.subf %118, %111 : vector<8x32xf32>
    %120 = arith.mulf %119, %117 : vector<8x32xf32>
    %121 = arith.mulf %111, %88 : vector<8x32xf32>
    %122 = arith.addf %120, %121 : vector<8x32xf32>
    %c2_i32 = arith.constant 2 : i32
    %123 = vector.broadcast %c2_i32 : i32 to vector<8x1xi32>
    %124 = arith.cmpi sgt, %26, %123 : vector<8x1xi32>
    %cst_52 = arith.constant 0.000000e+00 : f32
    %125 = vector.shape_cast %124 : vector<8x1xi1> to vector<8x1xi1>
    %126 = vector.broadcast %125 : vector<8x1xi1> to vector<8x32xi1>
    %127 = vector.broadcast %cst_52 : f32 to vector<8x32xf32>
    %128 = arith.select %126, %122, %127 : vector<8x32xi1>, vector<8x32xf32>
    %cst_53 = arith.constant dense<0.000000e+00> : vector<8x32xf32>
    %129 = tpu.matmul %122, %22, %cst_53 {dimension_numbers = #tpu.dot_dimension_numbers<[1], [0], [0], [1], [0, 0, 1, 1], [], []>} : vector<8x32xf32>, vector<32x32xf32>, vector<8x32xf32> -> vector<8x32xf32>
    %cst_54 = arith.constant dense<0.000000e+00> : vector<8x32xf32>
    %130 = tpu.matmul %122, %23, %cst_54 {dimension_numbers = #tpu.dot_dimension_numbers<[1], [0], [0], [1], [0, 0, 1, 1], [], []>} : vector<8x32xf32>, vector<32x32xf32>, vector<8x32xf32> -> vector<8x32xf32>
    %cst_55 = arith.constant dense<0.000000e+00> : vector<8x32xf32>
    %131 = tpu.matmul %122, %24, %cst_55 {dimension_numbers = #tpu.dot_dimension_numbers<[1], [0], [0], [1], [0, 0, 1, 1], [], []>} : vector<8x32xf32>, vector<32x32xf32>, vector<8x32xf32> -> vector<8x32xf32>
    %132 = vector.extract_strided_slice %5 {offsets = [24, 0], sizes = [8, 32], strides = [1, 1]} : vector<64x32xf32> to vector<8x32xf32>
    %133 = arith.addf %132, %129 : vector<8x32xf32>
    %134 = arith.negf %133 : vector<8x32xf32>
    %135 = math.exp %134 : vector<8x32xf32>
    %cst_56 = arith.constant 1.000000e+00 : f32
    %136 = vector.broadcast %cst_56 : f32 to vector<8x32xf32>
    %137 = arith.addf %136, %135 : vector<8x32xf32>
    %138 = arith.divf %136, %137 : vector<8x32xf32>
    %139 = vector.extract_strided_slice %10 {offsets = [24, 0], sizes = [8, 32], strides = [1, 1]} : vector<64x32xf32> to vector<8x32xf32>
    %140 = arith.addf %139, %130 : vector<8x32xf32>
    %141 = arith.negf %140 : vector<8x32xf32>
    %142 = math.exp %141 : vector<8x32xf32>
    %cst_57 = arith.constant 1.000000e+00 : f32
    %143 = vector.broadcast %cst_57 : f32 to vector<8x32xf32>
    %144 = arith.addf %143, %142 : vector<8x32xf32>
    %145 = arith.divf %143, %144 : vector<8x32xf32>
    %146 = vector.extract_strided_slice %15 {offsets = [24, 0], sizes = [8, 32], strides = [1, 1]} : vector<64x32xf32> to vector<8x32xf32>
    %147 = vector.broadcast %25 : vector<1x32xf32> to vector<8x32xf32>
    %148 = arith.addf %131, %147 : vector<8x32xf32>
    %149 = arith.mulf %138, %148 : vector<8x32xf32>
    %150 = arith.addf %146, %149 : vector<8x32xf32>
    %151 = math.tanh %150 : vector<8x32xf32>
    %cst_58 = arith.constant 1.000000e+00 : f32
    %152 = vector.broadcast %cst_58 : f32 to vector<8x32xf32>
    %153 = arith.subf %152, %145 : vector<8x32xf32>
    %154 = arith.mulf %153, %151 : vector<8x32xf32>
    %155 = arith.mulf %145, %122 : vector<8x32xf32>
    %156 = arith.addf %154, %155 : vector<8x32xf32>
    %c3_i32 = arith.constant 3 : i32
    %157 = vector.broadcast %c3_i32 : i32 to vector<8x1xi32>
    %158 = arith.cmpi sgt, %26, %157 : vector<8x1xi32>
    %cst_59 = arith.constant 0.000000e+00 : f32
    %159 = vector.shape_cast %158 : vector<8x1xi1> to vector<8x1xi1>
    %160 = vector.broadcast %159 : vector<8x1xi1> to vector<8x32xi1>
    %161 = vector.broadcast %cst_59 : f32 to vector<8x32xf32>
    %162 = arith.select %160, %156, %161 : vector<8x32xi1>, vector<8x32xf32>
    %cst_60 = arith.constant dense<0.000000e+00> : vector<8x32xf32>
    %163 = tpu.matmul %156, %22, %cst_60 {dimension_numbers = #tpu.dot_dimension_numbers<[1], [0], [0], [1], [0, 0, 1, 1], [], []>} : vector<8x32xf32>, vector<32x32xf32>, vector<8x32xf32> -> vector<8x32xf32>
    %cst_61 = arith.constant dense<0.000000e+00> : vector<8x32xf32>
    %164 = tpu.matmul %156, %23, %cst_61 {dimension_numbers = #tpu.dot_dimension_numbers<[1], [0], [0], [1], [0, 0, 1, 1], [], []>} : vector<8x32xf32>, vector<32x32xf32>, vector<8x32xf32> -> vector<8x32xf32>
    %cst_62 = arith.constant dense<0.000000e+00> : vector<8x32xf32>
    %165 = tpu.matmul %156, %24, %cst_62 {dimension_numbers = #tpu.dot_dimension_numbers<[1], [0], [0], [1], [0, 0, 1, 1], [], []>} : vector<8x32xf32>, vector<32x32xf32>, vector<8x32xf32> -> vector<8x32xf32>
    %166 = vector.extract_strided_slice %5 {offsets = [32, 0], sizes = [8, 32], strides = [1, 1]} : vector<64x32xf32> to vector<8x32xf32>
    %167 = arith.addf %166, %163 : vector<8x32xf32>
    %168 = arith.negf %167 : vector<8x32xf32>
    %169 = math.exp %168 : vector<8x32xf32>
    %cst_63 = arith.constant 1.000000e+00 : f32
    %170 = vector.broadcast %cst_63 : f32 to vector<8x32xf32>
    %171 = arith.addf %170, %169 : vector<8x32xf32>
    %172 = arith.divf %170, %171 : vector<8x32xf32>
    %173 = vector.extract_strided_slice %10 {offsets = [32, 0], sizes = [8, 32], strides = [1, 1]} : vector<64x32xf32> to vector<8x32xf32>
    %174 = arith.addf %173, %164 : vector<8x32xf32>
    %175 = arith.negf %174 : vector<8x32xf32>
    %176 = math.exp %175 : vector<8x32xf32>
    %cst_64 = arith.constant 1.000000e+00 : f32
    %177 = vector.broadcast %cst_64 : f32 to vector<8x32xf32>
    %178 = arith.addf %177, %176 : vector<8x32xf32>
    %179 = arith.divf %177, %178 : vector<8x32xf32>
    %180 = vector.extract_strided_slice %15 {offsets = [32, 0], sizes = [8, 32], strides = [1, 1]} : vector<64x32xf32> to vector<8x32xf32>
    %181 = vector.broadcast %25 : vector<1x32xf32> to vector<8x32xf32>
    %182 = arith.addf %165, %181 : vector<8x32xf32>
    %183 = arith.mulf %172, %182 : vector<8x32xf32>
    %184 = arith.addf %180, %183 : vector<8x32xf32>
    %185 = math.tanh %184 : vector<8x32xf32>
    %cst_65 = arith.constant 1.000000e+00 : f32
    %186 = vector.broadcast %cst_65 : f32 to vector<8x32xf32>
    %187 = arith.subf %186, %179 : vector<8x32xf32>
    %188 = arith.mulf %187, %185 : vector<8x32xf32>
    %189 = arith.mulf %179, %156 : vector<8x32xf32>
    %190 = arith.addf %188, %189 : vector<8x32xf32>
    %c4_i32 = arith.constant 4 : i32
    %191 = vector.broadcast %c4_i32 : i32 to vector<8x1xi32>
    %192 = arith.cmpi sgt, %26, %191 : vector<8x1xi32>
    %cst_66 = arith.constant 0.000000e+00 : f32
    %193 = vector.shape_cast %192 : vector<8x1xi1> to vector<8x1xi1>
    %194 = vector.broadcast %193 : vector<8x1xi1> to vector<8x32xi1>
    %195 = vector.broadcast %cst_66 : f32 to vector<8x32xf32>
    %196 = arith.select %194, %190, %195 : vector<8x32xi1>, vector<8x32xf32>
    %cst_67 = arith.constant dense<0.000000e+00> : vector<8x32xf32>
    %197 = tpu.matmul %190, %22, %cst_67 {dimension_numbers = #tpu.dot_dimension_numbers<[1], [0], [0], [1], [0, 0, 1, 1], [], []>} : vector<8x32xf32>, vector<32x32xf32>, vector<8x32xf32> -> vector<8x32xf32>
    %cst_68 = arith.constant dense<0.000000e+00> : vector<8x32xf32>
    %198 = tpu.matmul %190, %23, %cst_68 {dimension_numbers = #tpu.dot_dimension_numbers<[1], [0], [0], [1], [0, 0, 1, 1], [], []>} : vector<8x32xf32>, vector<32x32xf32>, vector<8x32xf32> -> vector<8x32xf32>
    %cst_69 = arith.constant dense<0.000000e+00> : vector<8x32xf32>
    %199 = tpu.matmul %190, %24, %cst_69 {dimension_numbers = #tpu.dot_dimension_numbers<[1], [0], [0], [1], [0, 0, 1, 1], [], []>} : vector<8x32xf32>, vector<32x32xf32>, vector<8x32xf32> -> vector<8x32xf32>
    %200 = vector.extract_strided_slice %5 {offsets = [40, 0], sizes = [8, 32], strides = [1, 1]} : vector<64x32xf32> to vector<8x32xf32>
    %201 = arith.addf %200, %197 : vector<8x32xf32>
    %202 = arith.negf %201 : vector<8x32xf32>
    %203 = math.exp %202 : vector<8x32xf32>
    %cst_70 = arith.constant 1.000000e+00 : f32
    %204 = vector.broadcast %cst_70 : f32 to vector<8x32xf32>
    %205 = arith.addf %204, %203 : vector<8x32xf32>
    %206 = arith.divf %204, %205 : vector<8x32xf32>
    %207 = vector.extract_strided_slice %10 {offsets = [40, 0], sizes = [8, 32], strides = [1, 1]} : vector<64x32xf32> to vector<8x32xf32>
    %208 = arith.addf %207, %198 : vector<8x32xf32>
    %209 = arith.negf %208 : vector<8x32xf32>
    %210 = math.exp %209 : vector<8x32xf32>
    %cst_71 = arith.constant 1.000000e+00 : f32
    %211 = vector.broadcast %cst_71 : f32 to vector<8x32xf32>
    %212 = arith.addf %211, %210 : vector<8x32xf32>
    %213 = arith.divf %211, %212 : vector<8x32xf32>
    %214 = vector.extract_strided_slice %15 {offsets = [40, 0], sizes = [8, 32], strides = [1, 1]} : vector<64x32xf32> to vector<8x32xf32>
    %215 = vector.broadcast %25 : vector<1x32xf32> to vector<8x32xf32>
    %216 = arith.addf %199, %215 : vector<8x32xf32>
    %217 = arith.mulf %206, %216 : vector<8x32xf32>
    %218 = arith.addf %214, %217 : vector<8x32xf32>
    %219 = math.tanh %218 : vector<8x32xf32>
    %cst_72 = arith.constant 1.000000e+00 : f32
    %220 = vector.broadcast %cst_72 : f32 to vector<8x32xf32>
    %221 = arith.subf %220, %213 : vector<8x32xf32>
    %222 = arith.mulf %221, %219 : vector<8x32xf32>
    %223 = arith.mulf %213, %190 : vector<8x32xf32>
    %224 = arith.addf %222, %223 : vector<8x32xf32>
    %c5_i32 = arith.constant 5 : i32
    %225 = vector.broadcast %c5_i32 : i32 to vector<8x1xi32>
    %226 = arith.cmpi sgt, %26, %225 : vector<8x1xi32>
    %cst_73 = arith.constant 0.000000e+00 : f32
    %227 = vector.shape_cast %226 : vector<8x1xi1> to vector<8x1xi1>
    %228 = vector.broadcast %227 : vector<8x1xi1> to vector<8x32xi1>
    %229 = vector.broadcast %cst_73 : f32 to vector<8x32xf32>
    %230 = arith.select %228, %224, %229 : vector<8x32xi1>, vector<8x32xf32>
    %cst_74 = arith.constant dense<0.000000e+00> : vector<8x32xf32>
    %231 = tpu.matmul %224, %22, %cst_74 {dimension_numbers = #tpu.dot_dimension_numbers<[1], [0], [0], [1], [0, 0, 1, 1], [], []>} : vector<8x32xf32>, vector<32x32xf32>, vector<8x32xf32> -> vector<8x32xf32>
    %cst_75 = arith.constant dense<0.000000e+00> : vector<8x32xf32>
    %232 = tpu.matmul %224, %23, %cst_75 {dimension_numbers = #tpu.dot_dimension_numbers<[1], [0], [0], [1], [0, 0, 1, 1], [], []>} : vector<8x32xf32>, vector<32x32xf32>, vector<8x32xf32> -> vector<8x32xf32>
    %cst_76 = arith.constant dense<0.000000e+00> : vector<8x32xf32>
    %233 = tpu.matmul %224, %24, %cst_76 {dimension_numbers = #tpu.dot_dimension_numbers<[1], [0], [0], [1], [0, 0, 1, 1], [], []>} : vector<8x32xf32>, vector<32x32xf32>, vector<8x32xf32> -> vector<8x32xf32>
    %234 = vector.extract_strided_slice %5 {offsets = [48, 0], sizes = [8, 32], strides = [1, 1]} : vector<64x32xf32> to vector<8x32xf32>
    %235 = arith.addf %234, %231 : vector<8x32xf32>
    %236 = arith.negf %235 : vector<8x32xf32>
    %237 = math.exp %236 : vector<8x32xf32>
    %cst_77 = arith.constant 1.000000e+00 : f32
    %238 = vector.broadcast %cst_77 : f32 to vector<8x32xf32>
    %239 = arith.addf %238, %237 : vector<8x32xf32>
    %240 = arith.divf %238, %239 : vector<8x32xf32>
    %241 = vector.extract_strided_slice %10 {offsets = [48, 0], sizes = [8, 32], strides = [1, 1]} : vector<64x32xf32> to vector<8x32xf32>
    %242 = arith.addf %241, %232 : vector<8x32xf32>
    %243 = arith.negf %242 : vector<8x32xf32>
    %244 = math.exp %243 : vector<8x32xf32>
    %cst_78 = arith.constant 1.000000e+00 : f32
    %245 = vector.broadcast %cst_78 : f32 to vector<8x32xf32>
    %246 = arith.addf %245, %244 : vector<8x32xf32>
    %247 = arith.divf %245, %246 : vector<8x32xf32>
    %248 = vector.extract_strided_slice %15 {offsets = [48, 0], sizes = [8, 32], strides = [1, 1]} : vector<64x32xf32> to vector<8x32xf32>
    %249 = vector.broadcast %25 : vector<1x32xf32> to vector<8x32xf32>
    %250 = arith.addf %233, %249 : vector<8x32xf32>
    %251 = arith.mulf %240, %250 : vector<8x32xf32>
    %252 = arith.addf %248, %251 : vector<8x32xf32>
    %253 = math.tanh %252 : vector<8x32xf32>
    %cst_79 = arith.constant 1.000000e+00 : f32
    %254 = vector.broadcast %cst_79 : f32 to vector<8x32xf32>
    %255 = arith.subf %254, %247 : vector<8x32xf32>
    %256 = arith.mulf %255, %253 : vector<8x32xf32>
    %257 = arith.mulf %247, %224 : vector<8x32xf32>
    %258 = arith.addf %256, %257 : vector<8x32xf32>
    %c6_i32 = arith.constant 6 : i32
    %259 = vector.broadcast %c6_i32 : i32 to vector<8x1xi32>
    %260 = arith.cmpi sgt, %26, %259 : vector<8x1xi32>
    %cst_80 = arith.constant 0.000000e+00 : f32
    %261 = vector.shape_cast %260 : vector<8x1xi1> to vector<8x1xi1>
    %262 = vector.broadcast %261 : vector<8x1xi1> to vector<8x32xi1>
    %263 = vector.broadcast %cst_80 : f32 to vector<8x32xf32>
    %264 = arith.select %262, %258, %263 : vector<8x32xi1>, vector<8x32xf32>
    %cst_81 = arith.constant dense<0.000000e+00> : vector<8x32xf32>
    %265 = tpu.matmul %258, %22, %cst_81 {dimension_numbers = #tpu.dot_dimension_numbers<[1], [0], [0], [1], [0, 0, 1, 1], [], []>} : vector<8x32xf32>, vector<32x32xf32>, vector<8x32xf32> -> vector<8x32xf32>
    %cst_82 = arith.constant dense<0.000000e+00> : vector<8x32xf32>
    %266 = tpu.matmul %258, %23, %cst_82 {dimension_numbers = #tpu.dot_dimension_numbers<[1], [0], [0], [1], [0, 0, 1, 1], [], []>} : vector<8x32xf32>, vector<32x32xf32>, vector<8x32xf32> -> vector<8x32xf32>
    %cst_83 = arith.constant dense<0.000000e+00> : vector<8x32xf32>
    %267 = tpu.matmul %258, %24, %cst_83 {dimension_numbers = #tpu.dot_dimension_numbers<[1], [0], [0], [1], [0, 0, 1, 1], [], []>} : vector<8x32xf32>, vector<32x32xf32>, vector<8x32xf32> -> vector<8x32xf32>
    %268 = vector.extract_strided_slice %5 {offsets = [56, 0], sizes = [8, 32], strides = [1, 1]} : vector<64x32xf32> to vector<8x32xf32>
    %269 = arith.addf %268, %265 : vector<8x32xf32>
    %270 = arith.negf %269 : vector<8x32xf32>
    %271 = math.exp %270 : vector<8x32xf32>
    %cst_84 = arith.constant 1.000000e+00 : f32
    %272 = vector.broadcast %cst_84 : f32 to vector<8x32xf32>
    %273 = arith.addf %272, %271 : vector<8x32xf32>
    %274 = arith.divf %272, %273 : vector<8x32xf32>
    %275 = vector.extract_strided_slice %10 {offsets = [56, 0], sizes = [8, 32], strides = [1, 1]} : vector<64x32xf32> to vector<8x32xf32>
    %276 = arith.addf %275, %266 : vector<8x32xf32>
    %277 = arith.negf %276 : vector<8x32xf32>
    %278 = math.exp %277 : vector<8x32xf32>
    %cst_85 = arith.constant 1.000000e+00 : f32
    %279 = vector.broadcast %cst_85 : f32 to vector<8x32xf32>
    %280 = arith.addf %279, %278 : vector<8x32xf32>
    %281 = arith.divf %279, %280 : vector<8x32xf32>
    %282 = vector.extract_strided_slice %15 {offsets = [56, 0], sizes = [8, 32], strides = [1, 1]} : vector<64x32xf32> to vector<8x32xf32>
    %283 = vector.broadcast %25 : vector<1x32xf32> to vector<8x32xf32>
    %284 = arith.addf %267, %283 : vector<8x32xf32>
    %285 = arith.mulf %274, %284 : vector<8x32xf32>
    %286 = arith.addf %282, %285 : vector<8x32xf32>
    %287 = math.tanh %286 : vector<8x32xf32>
    %cst_86 = arith.constant 1.000000e+00 : f32
    %288 = vector.broadcast %cst_86 : f32 to vector<8x32xf32>
    %289 = arith.subf %288, %281 : vector<8x32xf32>
    %290 = arith.mulf %289, %287 : vector<8x32xf32>
    %291 = arith.mulf %281, %258 : vector<8x32xf32>
    %292 = arith.addf %290, %291 : vector<8x32xf32>
    %c7_i32 = arith.constant 7 : i32
    %293 = vector.broadcast %c7_i32 : i32 to vector<8x1xi32>
    %294 = arith.cmpi sgt, %26, %293 : vector<8x1xi32>
    %cst_87 = arith.constant 0.000000e+00 : f32
    %295 = vector.shape_cast %294 : vector<8x1xi1> to vector<8x1xi1>
    %296 = vector.broadcast %295 : vector<8x1xi1> to vector<8x32xi1>
    %297 = vector.broadcast %cst_87 : f32 to vector<8x32xf32>
    %298 = arith.select %296, %292, %297 : vector<8x32xi1>, vector<8x32xf32>
    %299 = tpu.concatenate %60, %94, %128, %162, %196, %230, %264, %298 in 0 : vector<8x32xf32>, vector<8x32xf32>, vector<8x32xf32>, vector<8x32xf32>, vector<8x32xf32>, vector<8x32xf32>, vector<8x32xf32>, vector<8x32xf32> -> vector<64x32xf32>
    %c0_88 = arith.constant 0 : index
    %c0_89 = arith.constant 0 : index
    %300 = vector.load %arg15[%c0_88, %c0_89] : memref<32x128xf32, #tpu.memory_space<vmem>>, vector<32x128xf32>
    %cst_90 = arith.constant dense<0.000000e+00> : vector<64x128xf32>
    %301 = tpu.matmul %299, %300, %cst_90 {dimension_numbers = #tpu.dot_dimension_numbers<[1], [0], [0], [1], [0, 0, 1, 1], [], []>} : vector<64x32xf32>, vector<32x128xf32>, vector<64x128xf32> -> vector<64x128xf32>
    %c0_91 = arith.constant 0 : index
    %c0_92 = arith.constant 0 : index
    %302 = vector.load %arg16[%c0_91, %c0_92] : memref<1x128xf32, #tpu.memory_space<vmem>>, vector<1x128xf32>
    %303 = vector.broadcast %302 : vector<1x128xf32> to vector<64x128xf32>
    %304 = arith.addf %301, %303 : vector<64x128xf32>
    %cst_93 = arith.constant dense<0xFF800000> : vector<64xf32>
    %305 = vector.multi_reduction <maximumf>, %304, %cst_93 [1] : vector<64x128xf32> to vector<64xf32>
    %306 = vector.shape_cast %305 : vector<64xf32> to vector<64x1xf32>
    %307 = vector.broadcast %306 : vector<64x1xf32> to vector<64x128xf32>
    %308 = arith.subf %304, %307 : vector<64x128xf32>
    %309 = math.exp %308 : vector<64x128xf32>
    %cst_94 = arith.constant dense<0.000000e+00> : vector<64xf32>
    %310 = vector.multi_reduction <add>, %309, %cst_94 [1] : vector<64x128xf32> to vector<64xf32>
    %311 = vector.shape_cast %310 : vector<64xf32> to vector<64x1xf32>
    %312 = math.log %311 : vector<64x1xf32>
    %313 = vector.broadcast %312 : vector<64x1xf32> to vector<64x128xf32>
    %314 = arith.subf %308, %313 : vector<64x128xf32>
    %c0_95 = arith.constant 0 : index
    %c0_96 = arith.constant 0 : index
    %315 = vector.load %arg17[%c0_95, %c0_96] : memref<64x128xf32, #tpu.memory_space<vmem>>, vector<64x128xf32>
    tpu.vector_store %arg17[%c0_95, %c0_96], %314 {strides = array<i32>} : memref<64x128xf32, #tpu.memory_space<vmem>>, vector<64x128xf32>,
    return
  }
}

</mosaic_0001>

<bundles_post_ra>
// kernel: sentence_decoder_forward.1
= control target key start
LH: loop header
LB: loop body
LE: loop exit
PB: predicated region body
PF: predicated region fallthrough
CT: control target
= control target key end

     0   :  { %vm73_vm0 = vcmask 130048   ;;  %v3559_v9 = vmov 0.0   ;;  %vm3560_vm1 = vmmov 0   ;;  %vm440_vm2 = vcmask 64512   ;;  %s4214_s6 = inlined_call_operand.vmem [shape: f32[16,32], index: 6, kind: input, shape index: {}]   ;;  %s4215_s0 = inlined_call_operand.vmem [shape: f32[64,16], index: 0, kind: input, shape index: {}]   ;;  %s4216_s5 = inlined_call_operand.vmem [shape: f32[16,32], index: 5, kind: input, shape index: {}]   ;;  %s4217_s3 = inlined_call_operand.vmem [shape: f32[8,32], index: 3, kind: input, shape index: {}]   ;;  %s4218_s7 = inlined_call_operand.vmem [shape: f32[16,32], index: 7, kind: input, shape index: {}]   ;;  %s4219_s2 = inlined_call_operand.vmem [shape: f32[8,8], index: 2, kind: input, shape index: {}]   ;;  %s4220_s11 = inlined_call_operand.vmem [shape: f32[32,32], index: 11, kind: input, shape index: {}]   ;;  %s4221_s12 = inlined_call_operand.vmem [shape: f32[32,32], index: 12, kind: input, shape index: {}]   ;;  %s4222_s1 = inlined_call_operand.vmem [shape: s32[8,1], index: 1, kind: input, shape index: {}]   ;;  %s4223_s9 = inlined_call_operand.vmem [shape: f32[1,32], index: 9, kind: input, shape index: {}]   ;;  %s4224_s8 = inlined_call_operand.vmem [shape: f32[1,32], index: 8, kind: input, shape index: {}]   ;;  %s4225_s13 = inlined_call_operand.vmem [shape: f32[32,32], index: 13, kind: input, shape index: {}]   ;;  %s4226_s4 = inlined_call_operand.vmem [shape: f32[1,32], index: 4, kind: input, shape index: {}]   ;;  %s4227_s10 = inlined_call_operand.vmem [shape: f32[1,32], index: 10, kind: input, shape index: {}]   ;;  %s4228_s14 = inlined_call_operand.vmem [shape: f32[1,32], index: 14, kind: input, shape index: {}]   ;;  %s4229_s15 = inlined_call_operand.vmem [shape: f32[32,128], index: 15, kind: input, shape index: {}]   ;;  %s4230_s16 = inlined_call_operand.vmem [shape: f32[1,128], index: 16, kind: input, shape index: {}]   ;;  %s4231_s17 = inlined_call_operand.vmem [shape: f32[64,128], index: 17, kind: output, shape index: {}]  }
   0x1   :  { %4234 = sst [smem:[#allocation2_spill]] %s4214_s6  ;;  %v64_v4 = vld [vmem:[%s4216_s5] sm:$0xff]  ;;  %v65_v5 = vld [vmem:[%s4216_s5 + $0x8] sm:$0xff]  ;;  %v3561_v25 = vmov 0.0|0.0   ;;  %v516_v27 = vld [vmem:[%s4220_s11 + $0x10] sm:$0xff]  ;;  %v3562_v33 = vmov 0  }
   0x2   :  { %4235 = sst [smem:[#allocation3_spill]] %s4215_s0  ;;  %s4236_s26 = sld [smem:[#allocation2_spill]]  ;;  %v3275_v7 = vpack.c.bf16 %v65_v5, %v64_v4  ;;  %v432_v10 = vld [vmem:[%s4217_s3] sm:$0xff]  ;;  %v318_v13 = vld [vmem:[%s4218_s7 + $0x8] sm:$0xff]  ;;  %v517_v28 = vld [vmem:[%s4220_s11 + $0x18] sm:$0xff]  ;;  %3445 = vset.pattern.permute.xlu0 %v3562_v33  ;;  %3446 = vset.pattern.permute.xlu1 %v3562_v33  ;;  %vm528_vm4 = vcmask 261120  }
   0x3   :  { %s4237_s30 = sld [smem:[#allocation3_spill]]  ;;  %v317_v12 = vld [vmem:[%s4218_s7] sm:$0xff]  ;;  %v515_v21 = vld [vmem:[%s4220_s11 + $0x8] sm:$0xff]  ;;  %v3759_v29 = vpack.c.bf16 %v517_v28, %v516_v27  ;;  %v520_v30 = vld [vmem:[%s4221_s12 + $0x10] sm:$0xff] }
   0x4   :  { %3276 = vmatprep.subr.bf16.mxu0 %v3275_v7  ;;  %v3283_v17 = vpack.c.bf16 %v318_v13, %v317_v12  ;;  %v431_v19 = vld [vmem:[%s4219_s2] sm:$0xff]  ;;  %v519_v24 = vld [vmem:[%s4221_s12 + $0x8] sm:$0xff]  ;;  %v521_v31 = vld [vmem:[%s4221_s12 + $0x18] sm:$0xff] }
   0x5   :  { %3278 = vmatpush3.bf16.msra.mxu0 %v3275_v7  ;;  %v514_v20 = vld [vmem:[%s4220_s11] sm:$0xff]  ;;  %v3768_v32 = vpack.c.bf16 %v521_v31, %v520_v30  ;;  %v523_v56 = vld [vmem:[%s4225_s13 + $0x8] sm:$0xff]  ;;  %v525_v4 = vld [vmem:[%s4225_s13 + $0x18] sm:$0xff] }
   0x6   :  { %v3738_v22 = vpack.c.bf16 %v515_v21, %v514_v20  ;;  %v518_v23 = vld [vmem:[%s4221_s12] sm:$0xff] }
   0x7   :  { %v3748_v26 = vpack.c.bf16 %v519_v24, %v518_v23  ;;  %v3778_v34 = vld [vmem:[%s4222_s1] sm:$0xff] }
   0x8   :  { %v203_v0 = vld [vmem:[%s4236_s26] sm:$0xff]  ;;  %v204_v1 = vld [vmem:[%s4236_s26 + $0x8] sm:$0xff]  ;;  %vm769_vm3 = vcmp.gt.s32.totalorder %v3778_v34, 0  ;;  %vm1010_vm5 = vcmp.gt.s32.totalorder %v3778_v34, 1  ;;  %vm1251_vm6 = vcmp.gt.s32.totalorder %v3778_v34, 2  ;;  %vm1492_vm7 = vcmp.gt.s32.totalorder %v3778_v34, 3 }
   0x9   :  { %v58_v2 = vld [vmem:[%s4237_s30 + $0x10] sm:$0xff]  ;;  %v3279_v3 = vpack.c.bf16 %v204_v1, %v203_v0  ;;  %v59_v6 = vld [vmem:[%s4237_s30 + $0x18] sm:$0xff]  ;;  %v56_v8 = vld [vmem:[%s4237_s30] sm:$0xff]  ;;  %v770_v35 = vsel %vm769_vm3, 1, %v3562_v33  ;;  %vm1733_vm8 = vcmp.gt.s32.totalorder %v3778_v34, 4  ;;  %vm1974_vm9 = vcmp.gt.s32.totalorder %v3778_v34, 5 }
   0xa   :  { %2961 = vmatprep.mubr.msk.f32.mxu1 %vm73_vm0, %v58_v2  ;;  %v60_v11 = vld [vmem:[%s4237_s30 + $0x20] sm:$0xff]  ;;  %2942 = vmatprep.mubr.msk.f32.mxu0 %vm73_vm0, %v56_v8  ;;  %v57_v14 = vld [vmem:[%s4237_s30 + $0x8] sm:$0xff]  ;;  %v62_v16 = vld [vmem:[%s4237_s30 + $0x30] sm:$0xff]  ;;  %vm2215_vm10 = vcmp.gt.s32.totalorder %v3778_v34, 6  ;;  %vm2456_vm11 = vcmp.gt.s32.totalorder %v3778_v34, 7 }
   0xb   :  { %3439 = vmatprep.subr.bf16.mxu1 %v3279_v3  ;;  %v61_v15 = vld [vmem:[%s4237_s30 + $0x28] sm:$0xff]  ;;  %3280 = vmatprep.subr.bf16.mxu0 %v3279_v3  ;;  %v63_v18 = vld [vmem:[%s4237_s30 + $0x38] sm:$0xff]  ;;  %v3786_v36 = vld [vmem:[%s4223_s9] ss:$0 sm:$0xff] }
   0xc   :  { %3440 = vmatpush3.bf16.msra.mxu1 %v3279_v3  ;;  %2943 = vmatmul.mubr.msk.f32.vlgmr.msra.gmra.mrb[0].mxu0 %vm73_vm0, %v57_v14  ;;  %v3794_v40 = vld [vmem:[%s4224_s8] ss:$0 sm:$0xff] }
   0xd   :  { %2986 = vmatprep.subr.mxu1 %v3559_v9  ;;  %2945 = vmatprep.mubr.msk.f32.mxu0 %vm73_vm0, %v58_v2  ;;  %v522_v55 = vld [vmem:[%s4225_s13] sm:$0xff] }
   0xe   :  { %3282 = vmatpush3.bf16.msra.mxu0 %v3279_v3  ;;  %772 = vperm.xlu0 %3445, %v770_v35   ;;  %v2722_v59 = vld [vmem:[%s4226_s4] ss:$0 sm:$0xff]  ;;  %v3831_v62 = vpack.c.bf16 %v523_v56, %v522_v55  ;;  %v524_v3 = vld [vmem:[%s4225_s13 + $0x10] sm:$0xff] }
   0xf   :  { %2962 = vmatmul.mubr.msk.f32.vlgmr.msra.gmra.mrb[0].mxu1 %vm73_vm0, %v59_v6  ;;  %3284 = vmatprep.subr.bf16.mxu0 %v3283_v17  ;;  %v3852_v7 = vpack.c.bf16 %v525_v4, %v524_v3 }
  0x10   :  { %2987 = vmatpush3.msra.mxu1 %v432_v10  ;;  %2964 = vmatprep.mubr.msk.f32.mxu1 %vm73_vm0, %v60_v11 }
  0x11   :  { %2946 = vmatmul.mubr.msk.f32.gmra.mrb[2].mxu0 %vm73_vm0, %v59_v6  ;;  %3287 = vmatprep.subr.bf16.mxu1 %v3561_v25 }
  0x12   :  { %2948 = vmatprep.mubr.msk.f32.mxu0 %vm73_vm0, %v60_v11 }
  0x13   :  { %2965 = vmatmul.mubr.msk.f32.gmra.mrb[2].mxu1 %vm73_vm0, %v61_v15 }
  0x14   :  { %2967 = vmatprep.mubr.msk.f32.mxu1 %vm73_vm0, %v62_v16 }
  0x15   :  { %2949 = vmatmul.mubr.msk.f32.gmra.mrb[4].mxu0 %vm73_vm0, %v61_v15 }
  0x16   :  { %2951 = vmatprep.mubr.msk.f32.mxu0 %vm73_vm0, %v62_v16 }
  0x17   :  { %2968 = vmatmul.mubr.msk.f32.gmra.mrb[4].mxu1 %vm73_vm0, %v63_v18 }
  0x18   :  { %2988 = vmatprep.mubr.msk.f32.mxu1 %vm3560_vm1, %v3559_v9 }
  0x19   :  { %2952 = vmatmul.mubr.msk.f32.gmra.mrb[6].mxu0 %vm73_vm0, %v63_v18 }
  0x1a   :  { %2958 = vmatprep.mubr.msk.f32.mxu0 %vm73_vm0, %v56_v8 }
  0x1b   :  { %2989 = vmatmul.mubr.msk.f32.vlgmr.msra.gmra.mrb[6].mxu1 %vm440_vm2, %v431_v19 }
  0x1c   :  { %2999 = vmatprep.mubr.msk.f32.mxu1 %vm3560_vm1, %v3559_v9  ;;  %3289 = vmatpush3.bf16.msra.mxu1 %v3738_v22 }
  0x1d   :  { %2959 = vmatmul.mubr.msk.f32.vlgmr.msra.gmra.mrb[8].mxu0 %vm73_vm0, %v57_v14  ;;  %3290 = vmatprep.subr.bf16.mxu1 %v3561_v25 }
  0x1e   :  { %3286 = vmatpush3.bf16.msra.mxu0 %v3283_v17  ;;  %2974 = vmatprep.mubr.msk.f32.mxu0 %vm73_vm0, %v56_v8 }
  0x1f   :  { %3293 = vmatprep.subr.bf16.mxu0 %v3561_v25 }
  0x20   :  { %3292 = vmatpush3.bf16.msra.mxu1 %v3759_v29 }
  0x21   :  { %2975 = vmatmul.mubr.msk.f32.vlgmr.msra.gmra.mrb[10].mxu0 %vm73_vm0, %v57_v14  ;;  %3299 = vmatprep.subr.bf16.mxu1 %v3561_v25 }
  0x22   :  { %2977 = vmatprep.mubr.msk.f32.mxu0 %vm73_vm0, %v58_v2  ;;  %3295 = vmatpush3.bf16.msra.mxu0 %v3748_v26 }
  0x23   :  { %3296 = vmatprep.subr.bf16.mxu0 %v3561_v25 }
  0x25   :  { %2978 = vmatmul.mubr.msk.f32.gmra.mrb[12].mxu0 %vm73_vm0, %v59_v6 }
  0x26   :  { %2980 = vmatprep.mubr.msk.f32.mxu0 %vm73_vm0, %v60_v11  ;;  %3298 = vmatpush3.bf16.msra.mxu0 %v3768_v32 }
  0x27   :  { %3305 = vmatprep.subr.bf16.mxu0 %v3561_v25 }
  0x29   :  { %2981 = vmatmul.mubr.msk.f32.gmra.mrb[14].mxu0 %vm73_vm0, %v61_v15  ;;  %v2713_v15 = vld [vmem:[%s4227_s10] ss:$0 sm:$0xff] }
  0x2a   :  { %2983 = vmatprep.mubr.msk.f32.mxu0 %vm73_vm0, %v62_v16 }
  0x2d   :  { %2984 = vmatmul.mubr.msk.f32.gmra.mrb[16].mxu0 %vm73_vm0, %v63_v18 }
  0x2e   :  { %3010 = vmatprep.mubr.msk.f32.mxu0 %vm3560_vm1, %v3559_v9 }
  0xdf   :  { %v2944_v42 = vpop.f32.mrb[0].mxu0 }
  0xe0   :  { %v3800_v44 = vadd.f32 %v2944_v42, %v3794_v40  ;;  %v3802_v45 = vpop.f32.mrb[1].mxu0  ;;  %v1011_v42 = vsel %vm1010_vm5, 1, %v3562_v33 }
  0xe1   :  { %1013 = vperm.xlu0 %3445, %v1011_v42  }
  0xe2   :  { %v2963_v37 = vpop.f32.mrb[0].mxu1 }
  0xe3   :  { %v3789_v38 = vadd.f32 %v2963_v37, %v3786_v36  ;;  %v288_v39 = vpop.f32.mrb[1].mxu1 }
  0xe4   :  { %v3797_v41 = vadd.f32 %v3786_v36, %v288_v39  ;;  %v2947_v49 = vpop.f32.mrb[2].mxu0 }
  0xe5   :  { %v3811_v51 = vadd.f32 %v2947_v49, %v3794_v40  ;;  %v174_v52 = vpop.f32.mrb[3].mxu0 }
  0xe6   :  { %v2966_v43 = vpop.f32.mrb[2].mxu1  ;;  %v3823_v57 = vadd.f32 %v3794_v40, %v174_v52 }
  0xe7   :  { %v3805_v46 = vadd.f32 %v2966_v43, %v3786_v36  ;;  %v298_v47 = vpop.f32.mrb[3].mxu1  ;;  %v165_v43 = vadd.f32 %v3794_v40, %v3802_v45 }
  0xe8   :  { %v3808_v48 = vadd.f32 %v3786_v36, %v298_v47  ;;  %v2950_v60 = vpop.f32.mrb[4].mxu0 }
  0xe9   :  { %v3834_v63 = vadd.f32 %v2950_v60, %v3794_v40  ;;  %v184_v0 = vpop.f32.mrb[5].mxu0 }
  0xea   :  { %v2969_v50 = vpop.f32.mrb[4].mxu1  ;;  %v3845_v5 = vadd.f32 %v3794_v40, %v184_v0 }
  0xeb   :  { %v3814_v53 = vadd.f32 %v2969_v50, %v3786_v36  ;;  %v308_v54 = vpop.f32.mrb[5].mxu1 }
  0xec   :  { %v3826_v58 = vadd.f32 %v3786_v36, %v308_v54  ;;  %v2953_v6 = vpop.f32.mrb[6].mxu0 }
  0xed   :  { %v3857_v8 = vadd.f32 %v2953_v6, %v3794_v40  ;;  %v194_v10 = vpop.f32.mrb[7].mxu0 }
  0xee   :  { %v510_v61 = vpop.f32.mrb[6].mxu1  ;;  %v3861_v11 = vadd.f32 %v3794_v40, %v194_v10 }
  0xef   :  { %v3836_v1 = vadd.f32 %v2722_v59, %v510_v61  ;;  %v2990_v2 = vpop.f32.mrb[7].mxu1 }
  0xf0   :  { %v2960_v12 = vpop.f32.mrb[8].mxu0 }
  0xf1   :  { %3000 = vmatmul.mubr.msk.f32.vlgmr.msra.gmra.mrb[8].mxu1 %vm528_vm4, %v3836_v1  ;;  %3011 = vmatmul.mubr.msk.f32.vlgmr.msra.gmra.mrb[18].mxu0 %vm528_vm4, %v3836_v1  ;;  %v3869_v13 = vadd.f32 %v2960_v12, %v3786_v36  ;;  %v278_v14 = vpop.f32.mrb[9].mxu0 }
  0xf2   :  { %3301 = vmatpush3.bf16.msra.mxu1 %v3831_v62  ;;  %3021 = vmatprep.mubr.msk.f32.mxu1 %vm3560_vm1, %v3559_v9  ;;  %v279_v47 = vadd.f32 %v3786_v36, %v278_v14  ;;  %v3907_v36 = vld [vmem:[%s4228_s14] ss:$0 sm:$0xff] }
  0xf3   :  { %3302 = vmatprep.subr.bf16.mxu1 %v3561_v25  ;;  %3307 = vmatpush3.bf16.msra.mxu0 %v3738_v22 }
  0xf4   :  { %3308 = vmatprep.subr.bf16.mxu0 %v3561_v25  ;;  %3032 = vmatprep.mubr.msk.f32.mxu0 %vm3560_vm1, %v3559_v9  ;;  %v2976_v16 = vpop.f32.mrb[10].mxu0 }
  0xf5   :  { %v3879_v17 = vadd.f32 %v2976_v16, %v2713_v15  ;;  %v392_v18 = vpop.f32.mrb[11].mxu0 }
  0xf6   :  { %3304 = vmatpush3.bf16.msra.mxu1 %v3852_v7  ;;  %v393_v10 = vadd.f32 %v2713_v15, %v392_v18 }
  0xf7   :  { %3311 = vmatprep.subr.bf16.mxu1 %v3561_v25  ;;  %3310 = vmatpush3.bf16.msra.mxu0 %v3759_v29 }
  0xf8   :  { %3317 = vmatprep.subr.bf16.mxu0 %v3561_v25  ;;  %v2979_v19 = vpop.f32.mrb[12].mxu0 }
  0xf9   :  { %3022 = vmatmul.mubr.msk.f32.vlgmr.msra.gmra.mrb[10].mxu1 %vm528_vm4, %v3836_v1  ;;  %v3885_v20 = vadd.f32 %v2979_v19, %v2713_v15  ;;  %v402_v21 = vpop.f32.mrb[13].mxu0 }
  0xfa   :  { %3313 = vmatpush3.bf16.msra.mxu1 %v3748_v26  ;;  %3043 = vmatprep.mubr.msk.f32.mxu1 %vm3560_vm1, %v3559_v9  ;;  %v3888_v23 = vadd.f32 %v2713_v15, %v402_v21 }
  0xfb   :  { %3314 = vmatprep.subr.bf16.mxu1 %v3561_v25 }
  0xfc   :  { %v2982_v24 = vpop.f32.mrb[14].mxu0 }
  0xfd   :  { %v3891_v27 = vadd.f32 %v2982_v24, %v2713_v15  ;;  %v412_v28 = vpop.f32.mrb[15].mxu0 }
  0xfe   :  { %3316 = vmatpush3.bf16.msra.mxu1 %v3768_v32  ;;  %v3893_v30 = vadd.f32 %v2713_v15, %v412_v28 }
  0xff   :  { %3323 = vmatprep.subr.bf16.mxu1 %v3561_v25 }
 0x100   :  { %v2985_v31 = vpop.f32.mrb[16].mxu0 }
 0x101   :  { %v3895_v35 = vadd.f32 %v2985_v31, %v2713_v15  ;;  %v422_v37 = vpop.f32.mrb[17].mxu0 }
 0x102   :  { %v3897_v39 = vadd.f32 %v2713_v15, %v422_v37 }
 0x1c4   :  { %v598_v49 = vpop.f32.mrb[8].mxu1  ;;  %v668_v50 = vpop.f32.mrb[18].mxu0 }
 0x1c5   :  { %v672_v52 = vadd.f32 %v598_v49, %v165_v43  ;;  %v679_v54 = vadd.f32 %v668_v50, %v279_v47  ;;  %v3001_v55 = vpop.f32.mrb[9].mxu1  ;;  %v3012_v56 = vpop.f32.mrb[19].mxu0 }
 0x1c7   :  { %v2726_v59 = vmul.f32 -1.442695, %v672_v52  ;;  %v2727_v60 = vmul.f32 -1.442695, %v679_v54 }
 0x1c9   :  { %3447 = vpow2.f32 %v2726_v59 }
 0x1ca   :  { %3449 = vpow2.f32 %v2727_v60 }
 0x1cc   :  { %v758_v61 = vpop.f32.mrb[10].mxu1 }
 0x1cd   :  { %v3023_v0 = vpop.f32.mrb[11].mxu1  ;;  %v759_v45 = vadd.f32 %v3907_v36, %v758_v61 }
 0x1d3   :  { %v3448_v2 = vpop.eup %3447 }
 0x1d4   :  { %v676_v3 = vadd.f32 1.0, %v3448_v2  ;;  %v3450_v4 = vpop.eup %3449 }
 0x1d5   :  { %v683_v40 = vadd.f32 1.0, %v3450_v4 }
 0x1d6   :  { %3451 = vrcp.f32 %v676_v3 }
 0x1d7   :  { %3453 = vrcp.f32 %v683_v40 }
 0x1e0   :  { %v3452_v6 = vpop.eup %3451 }
 0x1e1   :  { %v762_v12 = vmul.f32 %v3452_v6, %v759_v45  ;;  %v3454_v16 = vpop.eup %3453 }
 0x1e2   :  { %v765_v19 = vsub.f32 1.0, %v3454_v16  ;;  %v767_v24 = vmul.f32 %v3454_v16, %v3836_v1  ;;  %v1252_v1 = vsel %vm1251_vm6, 1, %v3562_v33 }
 0x1e3   :  { %v763_v14 = vadd.f32 %v762_v12, %v393_v10  ;;  %1254 = vperm.xlu1 %3446, %v1252_v1  }
 0x1e5   :  { %3455 = vtanh.f32 %v763_v14 }
 0x1ef   :  { %v3456_v21 = vpop.eup %3455 }
 0x1f0   :  { %v766_v28 = vmul.f32 %v3456_v21, %v765_v19 }
 0x1f2   :  { %v3911_v31 = vadd.f32 %v767_v24, %v766_v28 }
 0x1f4   :  { %3033 = vmatmul.mubr.msk.f32.vlgmr.msra.gmra.mrb[20].mxu0 %vm528_vm4, %v3911_v31  ;;  %3044 = vmatmul.mubr.msk.f32.vlgmr.msra.gmra.mrb[12].mxu1 %vm528_vm4, %v3911_v31 }
 0x1f5   :  { %3319 = vmatpush3.bf16.msra.mxu0 %v3831_v62  ;;  %3054 = vmatprep.mubr.msk.f32.mxu0 %vm3560_vm1, %v3559_v9 }
 0x1f6   :  { %3320 = vmatprep.subr.bf16.mxu0 %v3561_v25  ;;  %3325 = vmatpush3.bf16.msra.mxu1 %v3738_v22 }
 0x1f7   :  { %3326 = vmatprep.subr.bf16.mxu1 %v3561_v25  ;;  %3065 = vmatprep.mubr.msk.f32.mxu1 %vm3560_vm1, %v3559_v9 }
 0x1f9   :  { %3322 = vmatpush3.bf16.msra.mxu0 %v3852_v7 }
 0x1fa   :  { %3329 = vmatprep.subr.bf16.mxu0 %v3561_v25  ;;  %3328 = vmatpush3.bf16.msra.mxu1 %v3759_v29 }
 0x1fb   :  { %3335 = vmatprep.subr.bf16.mxu1 %v3561_v25 }
 0x1fc   :  { %3055 = vmatmul.mubr.msk.f32.vlgmr.msra.gmra.mrb[22].mxu0 %vm528_vm4, %v3911_v31 }
 0x1fd   :  { %3331 = vmatpush3.bf16.msra.mxu0 %v3748_v26  ;;  %3076 = vmatprep.mubr.msk.f32.mxu0 %vm3560_vm1, %v3559_v9 }
 0x1fe   :  { %3332 = vmatprep.subr.bf16.mxu0 %v3561_v25 }
 0x201   :  { %3334 = vmatpush3.bf16.msra.mxu0 %v3768_v32 }
 0x202   :  { %3341 = vmatprep.subr.bf16.mxu0 %v3561_v25 }
 0x2c7   :  { %v845_v15 = vpop.f32.mrb[20].mxu0  ;;  %v915_v18 = vpop.f32.mrb[12].mxu1 }
 0x2c8   :  { %v919_v37 = vadd.f32 %v845_v15, %v3800_v44  ;;  %v926_v42 = vadd.f32 %v915_v18, %v3869_v13  ;;  %v3034_v43 = vpop.f32.mrb[21].mxu0  ;;  %v3045_v47 = vpop.f32.mrb[13].mxu1 }
 0x2ca   :  { %v2732_v49 = vmul.f32 -1.442695, %v919_v37  ;;  %v2733_v50 = vmul.f32 -1.442695, %v926_v42 }
 0x2cc   :  { %3457 = vpow2.f32 %v2732_v49 }
 0x2cd   :  { %3459 = vpow2.f32 %v2733_v50 }
 0x2cf   :  { %v999_v52 = vpop.f32.mrb[22].mxu0 }
 0x2d0   :  { %v3056_v54 = vpop.f32.mrb[23].mxu0  ;;  %v1000_v61 = vadd.f32 %v3907_v36, %v999_v52 }
 0x2d6   :  { %v3458_v55 = vpop.eup %3457 }
 0x2d7   :  { %v923_v56 = vadd.f32 1.0, %v3458_v55  ;;  %v3460_v59 = vpop.eup %3459 }
 0x2d8   :  { %v930_v60 = vadd.f32 1.0, %v3460_v59 }
 0x2d9   :  { %3461 = vrcp.f32 %v923_v56 }
 0x2da   :  { %3463 = vrcp.f32 %v930_v60 }
 0x2e3   :  { %v3462_v0 = vpop.eup %3461 }
 0x2e4   :  { %v1003_v44 = vmul.f32 %v3462_v0, %v1000_v61  ;;  %v3464_v2 = vpop.eup %3463 }
 0x2e5   :  { %v1006_v3 = vsub.f32 1.0, %v3464_v2  ;;  %v1008_v40 = vmul.f32 %v3464_v2, %v3911_v31 }
 0x2e6   :  { %v1004_v13 = vadd.f32 %v1003_v44, %v3879_v17  ;;  %v1493_v17 = vsel %vm1492_vm7, 1, %v3562_v33 }
 0x2e7   :  { %1495 = vperm.xlu1 %3446, %v1493_v17  }
 0x2e8   :  { %3465 = vtanh.f32 %v1004_v13 }
 0x2f2   :  { %v3466_v4 = vpop.eup %3465 }
 0x2f3   :  { %v1007_v45 = vmul.f32 %v3466_v4, %v1006_v3 }
 0x2f5   :  { %v3944_v6 = vadd.f32 %v1008_v40, %v1007_v45 }
 0x2f7   :  { %3066 = vmatmul.mubr.msk.f32.vlgmr.msra.gmra.mrb[14].mxu1 %vm528_vm4, %v3944_v6  ;;  %3077 = vmatmul.mubr.msk.f32.vlgmr.msra.gmra.mrb[24].mxu0 %vm528_vm4, %v3944_v6 }
 0x2f8   :  { %3337 = vmatpush3.bf16.msra.mxu1 %v3831_v62  ;;  %3087 = vmatprep.mubr.msk.f32.mxu1 %vm3560_vm1, %v3559_v9 }
 0x2f9   :  { %3338 = vmatprep.subr.bf16.mxu1 %v3561_v25  ;;  %3343 = vmatpush3.bf16.msra.mxu0 %v3738_v22 }
 0x2fa   :  { %3344 = vmatprep.subr.bf16.mxu0 %v3561_v25  ;;  %3098 = vmatprep.mubr.msk.f32.mxu0 %vm3560_vm1, %v3559_v9 }
 0x2fc   :  { %3340 = vmatpush3.bf16.msra.mxu1 %v3852_v7 }
 0x2fd   :  { %3347 = vmatprep.subr.bf16.mxu1 %v3561_v25  ;;  %3346 = vmatpush3.bf16.msra.mxu0 %v3759_v29 }
 0x2fe   :  { %3353 = vmatprep.subr.bf16.mxu0 %v3561_v25 }
 0x2ff   :  { %3088 = vmatmul.mubr.msk.f32.vlgmr.msra.gmra.mrb[16].mxu1 %vm528_vm4, %v3944_v6 }
 0x300   :  { %3349 = vmatpush3.bf16.msra.mxu1 %v3748_v26  ;;  %3109 = vmatprep.mubr.msk.f32.mxu1 %vm3560_vm1, %v3559_v9 }
 0x301   :  { %3350 = vmatprep.subr.bf16.mxu1 %v3561_v25 }
 0x304   :  { %3352 = vmatpush3.bf16.msra.mxu1 %v3768_v32 }
 0x305   :  { %3359 = vmatprep.subr.bf16.mxu1 %v3561_v25 }
 0x3ca   :  { %v1086_v10 = vpop.f32.mrb[14].mxu1  ;;  %v1156_v12 = vpop.f32.mrb[24].mxu0 }
 0x3cb   :  { %v1160_v14 = vadd.f32 %v1086_v10, %v3823_v57  ;;  %v1167_v16 = vadd.f32 %v1156_v12, %v3797_v41  ;;  %v3067_v19 = vpop.f32.mrb[15].mxu1  ;;  %v3078_v21 = vpop.f32.mrb[25].mxu0 }
 0x3cd   :  { %v2737_v24 = vmul.f32 -1.442695, %v1160_v14  ;;  %v2738_v28 = vmul.f32 -1.442695, %v1167_v16 }
 0x3cf   :  { %3467 = vpow2.f32 %v2737_v24 }
 0x3d0   :  { %3469 = vpow2.f32 %v2738_v28 }
 0x3d2   :  { %v1240_v1 = vpop.f32.mrb[16].mxu1 }
 0x3d3   :  { %v3089_v15 = vpop.f32.mrb[17].mxu1  ;;  %v1241_v47 = vadd.f32 %v3907_v36, %v1240_v1 }
 0x3d9   :  { %v3468_v18 = vpop.eup %3467 }
 0x3da   :  { %v1164_v37 = vadd.f32 1.0, %v3468_v18  ;;  %v3470_v42 = vpop.eup %3469 }
 0x3db   :  { %v1171_v43 = vadd.f32 1.0, %v3470_v42 }
 0x3dc   :  { %3471 = vrcp.f32 %v1164_v37 }
 0x3dd   :  { %3473 = vrcp.f32 %v1171_v43 }
 0x3e6   :  { %v3472_v49 = vpop.eup %3471 }
 0x3e7   :  { %v1244_v57 = vmul.f32 %v3472_v49, %v1241_v47  ;;  %v3474_v50 = vpop.eup %3473 }
 0x3e8   :  { %v1247_v52 = vsub.f32 1.0, %v3474_v50  ;;  %v1249_v55 = vmul.f32 %v3474_v50, %v3944_v6 }
 0x3e9   :  { %v1245_v41 = vadd.f32 %v1244_v57, %v3888_v23  ;;  %v1734_v23 = vsel %vm1733_vm8, 1, %v3562_v33 }
 0x3ea   :  { %1736 = vperm.xlu0 %3445, %v1734_v23  }
 0x3eb   :  { %3475 = vtanh.f32 %v1245_v41 }
 0x3f5   :  { %v3476_v54 = vpop.eup %3475 }
 0x3f6   :  { %v1248_v56 = vmul.f32 %v3476_v54, %v1247_v52 }
 0x3f8   :  { %v3977_v59 = vadd.f32 %v1249_v55, %v1248_v56 }
 0x3fa   :  { %3099 = vmatmul.mubr.msk.f32.vlgmr.msra.gmra.mrb[26].mxu0 %vm528_vm4, %v3977_v59  ;;  %3110 = vmatmul.mubr.msk.f32.vlgmr.msra.gmra.mrb[18].mxu1 %vm528_vm4, %v3977_v59 }
 0x3fb   :  { %3355 = vmatpush3.bf16.msra.mxu0 %v3831_v62  ;;  %3120 = vmatprep.mubr.msk.f32.mxu0 %vm3560_vm1, %v3559_v9 }
 0x3fc   :  { %3356 = vmatprep.subr.bf16.mxu0 %v3561_v25  ;;  %3361 = vmatpush3.bf16.msra.mxu1 %v3738_v22 }
 0x3fd   :  { %3362 = vmatprep.subr.bf16.mxu1 %v3561_v25  ;;  %3131 = vmatprep.mubr.msk.f32.mxu1 %vm3560_vm1, %v3559_v9 }
 0x3ff   :  { %3358 = vmatpush3.bf16.msra.mxu0 %v3852_v7 }
 0x400   :  { %3365 = vmatprep.subr.bf16.mxu0 %v3561_v25  ;;  %3364 = vmatpush3.bf16.msra.mxu1 %v3759_v29 }
 0x401   :  { %3371 = vmatprep.subr.bf16.mxu1 %v3561_v25 }
 0x402   :  { %3121 = vmatmul.mubr.msk.f32.vlgmr.msra.gmra.mrb[28].mxu0 %vm528_vm4, %v3977_v59 }
 0x403   :  { %3367 = vmatpush3.bf16.msra.mxu0 %v3748_v26  ;;  %3142 = vmatprep.mubr.msk.f32.mxu0 %vm3560_vm1, %v3559_v9 }
 0x404   :  { %3368 = vmatprep.subr.bf16.mxu0 %v3561_v25 }
 0x407   :  { %3370 = vmatpush3.bf16.msra.mxu0 %v3768_v32 }
 0x408   :  { %3377 = vmatprep.subr.bf16.mxu0 %v3561_v25 }
 0x4cd   :  { %v1327_v60 = vpop.f32.mrb[26].mxu0  ;;  %v1397_v61 = vpop.f32.mrb[18].mxu1 }
 0x4ce   :  { %v1401_v0 = vadd.f32 %v1327_v60, %v3811_v51  ;;  %v1408_v44 = vadd.f32 %v1397_v61, %v3789_v38  ;;  %v3100_v13 = vpop.f32.mrb[27].mxu0  ;;  %v3111_v2 = vpop.f32.mrb[19].mxu1 }
 0x4d0   :  { %v2742_v3 = vmul.f32 -1.442695, %v1401_v0  ;;  %v2743_v4 = vmul.f32 -1.442695, %v1408_v44 }
 0x4d2   :  { %3477 = vpow2.f32 %v2742_v3 }
 0x4d3   :  { %3479 = vpow2.f32 %v2743_v4 }
 0x4d5   :  { %v1481_v40 = vpop.f32.mrb[28].mxu0 }
 0x4d6   :  { %v3122_v45 = vpop.f32.mrb[29].mxu0  ;;  %v1482_v16 = vadd.f32 %v3907_v36, %v1481_v40 }
 0x4dc   :  { %v3478_v17 = vpop.eup %3477 }
 0x4dd   :  { %v1405_v10 = vadd.f32 1.0, %v3478_v17  ;;  %v3480_v12 = vpop.eup %3479 }
 0x4de   :  { %v1412_v14 = vadd.f32 1.0, %v3480_v12 }
 0x4df   :  { %3481 = vrcp.f32 %v1405_v10 }
 0x4e0   :  { %3483 = vrcp.f32 %v1412_v14 }
 0x4e9   :  { %v3482_v19 = vpop.eup %3481 }
 0x4ea   :  { %v1485_v51 = vmul.f32 %v3482_v19, %v1482_v16  ;;  %v3484_v21 = vpop.eup %3483 }
 0x4eb   :  { %v1488_v24 = vsub.f32 1.0, %v3484_v21  ;;  %v1490_v1 = vmul.f32 %v3484_v21, %v3977_v59 }
 0x4ec   :  { %v1486_v38 = vadd.f32 %v1485_v51, %v3885_v20  ;;  %v1975_v20 = vsel %vm1974_vm9, 1, %v3562_v33 }
 0x4ed   :  { %1977 = vperm.xlu1 %3446, %v1975_v20  }
 0x4ee   :  { %3485 = vtanh.f32 %v1486_v38 }
 0x4f8   :  { %v3486_v28 = vpop.eup %3485 }
 0x4f9   :  { %v1489_v15 = vmul.f32 %v3486_v28, %v1488_v24 }
 0x4fb   :  { %v4010_v18 = vadd.f32 %v1490_v1, %v1489_v15 }
 0x4fd   :  { %3132 = vmatmul.mubr.msk.f32.vlgmr.msra.gmra.mrb[20].mxu1 %vm528_vm4, %v4010_v18  ;;  %3143 = vmatmul.mubr.msk.f32.vlgmr.msra.gmra.mrb[30].mxu0 %vm528_vm4, %v4010_v18 }
 0x4fe   :  { %3373 = vmatpush3.bf16.msra.mxu1 %v3831_v62  ;;  %3153 = vmatprep.mubr.msk.f32.mxu1 %vm3560_vm1, %v3559_v9 }
 0x4ff   :  { %3374 = vmatprep.subr.bf16.mxu1 %v3561_v25  ;;  %3379 = vmatpush3.bf16.msra.mxu0 %v3738_v22 }
 0x500   :  { %3380 = vmatprep.subr.bf16.mxu0 %v3561_v25  ;;  %3164 = vmatprep.mubr.msk.f32.mxu0 %vm3560_vm1, %v3559_v9 }
 0x502   :  { %3376 = vmatpush3.bf16.msra.mxu1 %v3852_v7 }
 0x503   :  { %3383 = vmatprep.subr.bf16.mxu1 %v3561_v25  ;;  %3382 = vmatpush3.bf16.msra.mxu0 %v3759_v29 }
 0x504   :  { %3389 = vmatprep.subr.bf16.mxu0 %v3561_v25 }
 0x505   :  { %3154 = vmatmul.mubr.msk.f32.vlgmr.msra.gmra.mrb[22].mxu1 %vm528_vm4, %v4010_v18 }
 0x506   :  { %3385 = vmatpush3.bf16.msra.mxu1 %v3748_v26  ;;  %3175 = vmatprep.mubr.msk.f32.mxu1 %vm3560_vm1, %v3559_v9 }
 0x507   :  { %3386 = vmatprep.subr.bf16.mxu1 %v3561_v25 }
 0x50a   :  { %3388 = vmatpush3.bf16.msra.mxu1 %v3768_v32 }
 0x50b   :  { %3395 = vmatprep.subr.bf16.mxu1 %v3561_v25 }
 0x5d0   :  { %v1568_v37 = vpop.f32.mrb[20].mxu1  ;;  %v1638_v42 = vpop.f32.mrb[30].mxu0 }
 0x5d1   :  { %v1642_v43 = vadd.f32 %v1568_v37, %v3845_v5  ;;  %v1649_v47 = vadd.f32 %v1638_v42, %v3808_v48  ;;  %v3133_v49 = vpop.f32.mrb[21].mxu1  ;;  %v3144_v57 = vpop.f32.mrb[31].mxu0 }
 0x5d3   :  { %v2747_v41 = vmul.f32 -1.442695, %v1642_v43  ;;  %v2748_v50 = vmul.f32 -1.442695, %v1649_v47 }
 0x5d5   :  { %3487 = vpow2.f32 %v2747_v41 }
 0x5d6   :  { %3489 = vpow2.f32 %v2748_v50 }
 0x5d8   :  { %v1722_v52 = vpop.f32.mrb[22].mxu1 }
 0x5d9   :  { %v3155_v54 = vpop.f32.mrb[23].mxu1  ;;  %v1723_v61 = vadd.f32 %v3907_v36, %v1722_v52 }
 0x5df   :  { %v3488_v55 = vpop.eup %3487 }
 0x5e0   :  { %v1646_v56 = vadd.f32 1.0, %v3488_v55  ;;  %v3490_v23 = vpop.eup %3489 }
 0x5e1   :  { %v1653_v60 = vadd.f32 1.0, %v3490_v23 }
 0x5e2   :  { %3491 = vrcp.f32 %v1646_v56 }
 0x5e3   :  { %3493 = vrcp.f32 %v1653_v60 }
 0x5ec   :  { %v3492_v0 = vpop.eup %3491 }
 0x5ed   :  { %v1726_v5 = vmul.f32 %v3492_v0, %v1723_v61  ;;  %v3494_v44 = vpop.eup %3493 }
 0x5ee   :  { %v1729_v13 = vsub.f32 1.0, %v3494_v44  ;;  %v1731_v3 = vmul.f32 %v3494_v44, %v4010_v18 }
 0x5ef   :  { %v1727_v48 = vadd.f32 %v1726_v5, %v3893_v30  ;;  %v2216_v30 = vsel %vm2215_vm10, 1, %v3562_v33 }
 0x5f0   :  { %2218 = vperm.xlu0 %3445, %v2216_v30   ;;  %v773_v30 = vpop.permute.xlu0 %772 }
 0x5f1   :  { %3495 = vtanh.f32 %v1727_v48  ;;  %vm774_vm12 = vcmp.eq.s32.totalorder %v773_v30, 1 }
 0x5fb   :  { %v3496_v2 = vpop.eup %3495 }
 0x5fc   :  { %v1730_v4 = vmul.f32 %v3496_v2, %v1729_v13 }
 0x5fe   :  { %v4043_v40 = vadd.f32 %v1731_v3, %v1730_v4 }
 0x600   :  { %3165 = vmatmul.mubr.msk.f32.vlgmr.msra.gmra.mrb[32].mxu0 %vm528_vm4, %v4043_v40  ;;  %3176 = vmatmul.mubr.msk.f32.vlgmr.msra.gmra.mrb[24].mxu1 %vm528_vm4, %v4043_v40 }
 0x601   :  { %3391 = vmatpush3.bf16.msra.mxu0 %v3831_v62  ;;  %3186 = vmatprep.mubr.msk.f32.mxu0 %vm3560_vm1, %v3559_v9 }
 0x602   :  { %3392 = vmatprep.subr.bf16.mxu0 %v3561_v25  ;;  %3397 = vmatpush3.bf16.msra.mxu1 %v3738_v22 }
 0x603   :  { %3398 = vmatprep.subr.bf16.mxu1 %v3561_v25  ;;  %3197 = vmatprep.mubr.msk.f32.mxu1 %vm3560_vm1, %v3559_v9 }
 0x605   :  { %3394 = vmatpush3.bf16.msra.mxu0 %v3852_v7 }
 0x606   :  { %3401 = vmatprep.subr.bf16.mxu0 %v3561_v25  ;;  %3400 = vmatpush3.bf16.msra.mxu1 %v3759_v29 }
 0x607   :  { %3407 = vmatprep.subr.bf16.mxu1 %v3561_v25 }
 0x608   :  { %3187 = vmatmul.mubr.msk.f32.vlgmr.msra.gmra.mrb[34].mxu0 %vm528_vm4, %v4043_v40 }
 0x609   :  { %3403 = vmatpush3.bf16.msra.mxu0 %v3748_v26  ;;  %3208 = vmatprep.mubr.msk.f32.mxu0 %vm3560_vm1, %v3559_v9 }
 0x60a   :  { %3404 = vmatprep.subr.bf16.mxu0 %v3561_v25 }
 0x60d   :  { %3406 = vmatpush3.bf16.msra.mxu0 %v3768_v32 }
 0x60e   :  { %3413 = vmatprep.subr.bf16.mxu0 %v3561_v25 }
 0x6d3   :  { %v1809_v45 = vpop.f32.mrb[32].mxu0  ;;  %v1879_v17 = vpop.f32.mrb[24].mxu1 }
 0x6d4   :  { %v1883_v10 = vadd.f32 %v1809_v45, %v3834_v63  ;;  %v1890_v12 = vadd.f32 %v1879_v17, %v3805_v46  ;;  %v3166_v14 = vpop.f32.mrb[33].mxu0  ;;  %v3177_v16 = vpop.f32.mrb[25].mxu1 }
 0x6d5   :  { %v775_v16 = vsel %vm774_vm12, %v3911_v31, 0.0 }
 0x6d6   :  { %v2752_v19 = vmul.f32 -1.442695, %v1883_v10  ;;  %v2753_v51 = vmul.f32 -1.442695, %v1890_v12  ;;  %v2465_v10 = vld [vmem:[%s4229_s15 + $0x10] sm:$0xff]  ;;  %v2466_v12 = vld [vmem:[%s4229_s15 + $0x18] sm:$0xff] }
 0x6d8   :  { %3497 = vpow2.f32 %v2752_v19  ;;  %v1014_v19 = vpop.permute.xlu0 %1013 }
 0x6d9   :  { %3499 = vpow2.f32 %v2753_v51  ;;  %v1255_v51 = vpop.permute.xlu1 %1254  ;;  %vm1015_vm13 = vcmp.eq.s32.totalorder %v1014_v19, 1 }
 0x6da   :  { %vm1256_vm14 = vcmp.eq.s32.totalorder %v1255_v51, 1 }
 0x6db   :  { %v1963_v38 = vpop.f32.mrb[34].mxu0 }
 0x6dc   :  { %v3188_v21 = vpop.f32.mrb[35].mxu0  ;;  %v1964_v20 = vadd.f32 %v3907_v36, %v1963_v38  ;;  %v1737_v31 = vpop.permute.xlu0 %1736 }
 0x6dd   :  { %v1496_v38 = vpop.permute.xlu1 %1495  ;;  %v1016_v21 = vsel %vm1015_vm13, %v3944_v6, 0.0  ;;  %vm1738_vm0 = vcmp.eq.s32.totalorder %v1737_v31, 1 }
 0x6de   :  { %vm1497_vm15 = vcmp.eq.s32.totalorder %v1496_v38, 1 }
 0x6e2   :  { %v3498_v24 = vpop.eup %3497 }
 0x6e3   :  { %v1887_v28 = vadd.f32 1.0, %v3498_v24  ;;  %v3500_v1 = vpop.eup %3499  ;;  %v1498_v24 = vsel %vm1497_vm15, %v4010_v18, 0.0 }
 0x6e4   :  { %v1894_v15 = vadd.f32 1.0, %v3500_v1 }
 0x6e5   :  { %3501 = vrcp.f32 %v1887_v28 }
 0x6e6   :  { %3503 = vrcp.f32 %v1894_v15 }
 0x6ef   :  { %v3502_v37 = vpop.eup %3501 }
 0x6f0   :  { %v1967_v63 = vmul.f32 %v3502_v37, %v1964_v20  ;;  %v3504_v42 = vpop.eup %3503 }
 0x6f1   :  { %v1970_v43 = vsub.f32 1.0, %v3504_v42  ;;  %v1972_v49 = vmul.f32 %v3504_v42, %v4043_v40 }
 0x6f2   :  { %v1968_v46 = vadd.f32 %v1967_v63, %v3891_v27  ;;  %v4152_v63 = vld [vmem:[%s4230_s16] ss:$0 sm:$0xff] }
 0x6f4   :  { %3505 = vtanh.f32 %v1968_v46 }
 0x6fe   :  { %v3506_v47 = vpop.eup %3505 }
 0x6ff   :  { %v1971_v57 = vmul.f32 %v3506_v47, %v1970_v43 }
 0x701   :  { %v4076_v41 = vadd.f32 %v1972_v49, %v1971_v57 }
 0x703   :  { %3198 = vmatmul.mubr.msk.f32.vlgmr.msra.gmra.mrb[26].mxu1 %vm528_vm4, %v4076_v41  ;;  %3209 = vmatmul.mubr.msk.f32.vlgmr.msra.gmra.mrb[36].mxu0 %vm528_vm4, %v4076_v41 }
 0x704   :  { %3409 = vmatpush3.bf16.msra.mxu1 %v3831_v62  ;;  %3219 = vmatprep.mubr.msk.f32.mxu1 %vm3560_vm1, %v3559_v9 }
 0x705   :  { %3410 = vmatprep.subr.bf16.mxu1 %v3561_v25  ;;  %3415 = vmatpush3.bf16.msra.mxu0 %v3738_v22  ;;  %v2463_v22 = vld [vmem:[%s4229_s15] sm:$0xff] }
 0x706   :  { %3416 = vmatprep.subr.bf16.mxu0 %v3561_v25  ;;  %3230 = vmatprep.mubr.msk.f32.mxu0 %vm3560_vm1, %v3559_v9 }
 0x708   :  { %3412 = vmatpush3.bf16.msra.mxu1 %v3852_v7 }
 0x709   :  { %3419 = vmatprep.subr.bf16.mxu1 %v3561_v25  ;;  %3418 = vmatpush3.bf16.msra.mxu0 %v3759_v29  ;;  %v2464_v29 = vld [vmem:[%s4229_s15 + $0x8] sm:$0xff] }
 0x70a   :  { %3425 = vmatprep.subr.bf16.mxu0 %v3561_v25  ;;  %v3431_v27 = vpack.c.bf16 %v2464_v29, %v2463_v22 }
 0x70b   :  { %3220 = vmatmul.mubr.msk.f32.vlgmr.msra.gmra.mrb[28].mxu1 %vm528_vm4, %v4076_v41 }
 0x70c   :  { %3421 = vmatpush3.bf16.msra.mxu1 %v3748_v26  ;;  %3241 = vmatprep.mubr.msk.f32.mxu1 %vm3560_vm1, %v3559_v9  ;;  %v2457_v26 = vsel %vm2456_vm11, 1, %v3562_v33 }
 0x70d   :  { %3422 = vmatprep.subr.bf16.mxu1 %v3561_v25  ;;  %2459 = vperm.xlu1 %3446, %v2457_v26  }
 0x710   :  { %3424 = vmatpush3.bf16.msra.mxu1 %v3768_v32 }
 0x711   :  { %3432 = vmatprep.subr.bf16.mxu1 %v3431_v27 }
 0x7d6   :  { %v2050_v50 = vpop.f32.mrb[26].mxu1  ;;  %v2120_v52 = vpop.f32.mrb[36].mxu0 }
 0x7d7   :  { %v2124_v54 = vadd.f32 %v2050_v50, %v3861_v11  ;;  %v2131_v32 = vadd.f32 %v2120_v52, %v3826_v58  ;;  %v3199_v55 = vpop.f32.mrb[27].mxu1  ;;  %v3210_v56 = vpop.f32.mrb[37].mxu0 }
 0x7d9   :  { %v2757_v23 = vmul.f32 -1.442695, %v2124_v54  ;;  %v2758_v60 = vmul.f32 -1.442695, %v2131_v32 }
 0x7db   :  { %3507 = vpow2.f32 %v2757_v23 }
 0x7dc   :  { %3509 = vpow2.f32 %v2758_v60 }
 0x7de   :  { %v2204_v61 = vpop.f32.mrb[28].mxu1 }
 0x7df   :  { %v3221_v0 = vpop.f32.mrb[29].mxu1  ;;  %v2205_v44 = vadd.f32 %v3907_v36, %v2204_v61 }
 0x7e5   :  { %v3508_v5 = vpop.eup %3507 }
 0x7e6   :  { %v2128_v48 = vadd.f32 1.0, %v3508_v5  ;;  %v3510_v34 = vpop.eup %3509 }
 0x7e7   :  { %v2135_v33 = vadd.f32 1.0, %v3510_v34 }
 0x7e8   :  { %3511 = vrcp.f32 %v2128_v48 }
 0x7e9   :  { %3513 = vrcp.f32 %v2135_v33 }
 0x7f2   :  { %v3512_v13 = vpop.eup %3511 }
 0x7f3   :  { %v2208_v11 = vmul.f32 %v3512_v13, %v2205_v44  ;;  %v3514_v2 = vpop.eup %3513 }
 0x7f4   :  { %v2211_v3 = vsub.f32 1.0, %v3514_v2  ;;  %v2213_v45 = vmul.f32 %v3514_v2, %v4076_v41 }
 0x7f5   :  { %v2209_v58 = vadd.f32 %v2208_v11, %v3897_v39  ;;  %v3435_v39 = vpack.c.bf16 %v2466_v12, %v2465_v10 }
 0x7f7   :  { %3515 = vtanh.f32 %v2209_v58 }
 0x801   :  { %v3516_v4 = vpop.eup %3515 }
 0x802   :  { %v2212_v17 = vmul.f32 %v3516_v4, %v2211_v3 }
 0x804   :  { %v4120_v14 = vadd.f32 %v2213_v45, %v2212_v17 }
 0x806   :  { %3231 = vmatmul.mubr.msk.f32.vlgmr.msra.gmra.mrb[38].mxu0 %vm528_vm4, %v4120_v14  ;;  %3242 = vmatmul.mubr.msk.f32.vlgmr.msra.gmra.mrb[30].mxu1 %vm528_vm4, %v4120_v14 }
 0x807   :  { %3427 = vmatpush3.bf16.msra.mxu0 %v3831_v62  ;;  %3434 = vmatpush3.bf16.msra.mxu1 %v3431_v27  ;;  %v1257_v62 = vsel %vm1256_vm14, %v3977_v59, 0.0 }
 0x808   :  { %3263 = vmatprep.mubr.msk.f32.mxu1 %vm528_vm4, %v775_v16  ;;  %3428 = vmatprep.subr.bf16.mxu0 %v3561_v25  ;;  %v1978_v25 = vpop.permute.xlu1 %1977 }
 0x809   :  { %3436 = vmatprep.subr.bf16.mxu1 %v3435_v39  ;;  %3252 = vmatprep.mubr.msk.f32.mxu0 %vm3560_vm1, %v3559_v9  ;;  %v2219_v9 = vpop.permute.xlu0 %2218  ;;  %vm1979_vm1 = vcmp.eq.s32.totalorder %v1978_v25, 1 }
 0x80a   :  { %vm2220_vm2 = vcmp.eq.s32.totalorder %v2219_v9, 1  ;;  %v1980_v6 = vsel %vm1979_vm1, %v4076_v41, 0.0 }
 0x80b   :  { %3430 = vmatpush3.bf16.msra.mxu0 %v3852_v7  ;;  %3438 = vmatpush3.bf16.msra.mxu1 %v3435_v39  ;;  %v1739_v7 = vsel %vm1738_vm0, %v4043_v40, 0.0  ;;  %v2221_v59 = vsel %vm2220_vm2, %v4120_v14, 0.0 }
 0x80c   :  { %v2460_v33 = vpop.permute.xlu1 %2459 }
 0x80d   :  { %vm2461_vm3 = vcmp.eq.s32.totalorder %v2460_v33, 1 }
 0x80e   :  { %3253 = vmatmul.mubr.msk.f32.vlgmr.msra.gmra.mrb[40].mxu0 %vm528_vm4, %v4120_v14  ;;  %3264 = vmatmul.mubr.msk.f32.vlgmr.msra.gmra.mrb[32].mxu1 %vm528_vm4, %v1016_v21 }
 0x80f   :  { %3266 = vmatprep.mubr.msk.f32.mxu1 %vm528_vm4, %v1257_v62 }
 0x812   :  { %3267 = vmatmul.mubr.msk.f32.gmra.mrb[34].mxu1 %vm528_vm4, %v1498_v24 }
 0x813   :  { %3269 = vmatprep.mubr.msk.f32.mxu1 %vm528_vm4, %v1739_v7 }
 0x816   :  { %3270 = vmatmul.mubr.msk.f32.gmra.mrb[36].mxu1 %vm528_vm4, %v1980_v6 }
 0x817   :  { %3272 = vmatprep.mubr.msk.f32.mxu1 %vm528_vm4, %v2221_v59 }
 0x8d9   :  { %v2291_v28 = vpop.f32.mrb[38].mxu0  ;;  %v2361_v1 = vpop.f32.mrb[30].mxu1 }
 0x8da   :  { %v2365_v18 = vadd.f32 %v2291_v28, %v3857_v8  ;;  %v2372_v40 = vadd.f32 %v2361_v1, %v3814_v53  ;;  %v3232_v15 = vpop.f32.mrb[39].mxu0  ;;  %v3243_v20 = vpop.f32.mrb[31].mxu1 }
 0x8dc   :  { %v2762_v37 = vmul.f32 -1.442695, %v2365_v18  ;;  %v2763_v46 = vmul.f32 -1.442695, %v2372_v40 }
 0x8de   :  { %3517 = vpow2.f32 %v2762_v37 }
 0x8df   :  { %3519 = vpow2.f32 %v2763_v46 }
 0x8e1   :  { %v2445_v42 = vpop.f32.mrb[40].mxu0  ;;  %v3265_v43 = vpop.f32.mrb[32].mxu1 }
 0x8e2   :  { %v2570_v47 = vadd.f32 %v3265_v43, %v4152_v63  ;;  %v3254_v49 = vpop.f32.mrb[41].mxu0  ;;  %v2564_v57 = vpop.f32.mrb[33].mxu1  ;;  %v2446_v23 = vadd.f32 %v3907_v36, %v2445_v42 }
 0x8e3   :  { %v2565_v8 = vadd.f32 %v4152_v63, %v2564_v57 }
 0x8e4   :  { %2605 = vmax.xlane.f32.xlu1 %v2570_v47 }
 0x8e5   :  { %v3268_v53 = vpop.f32.mrb[34].mxu1  ;;  %2603 = vmax.xlane.f32.xlu0 %v2565_v8 }
 0x8e6   :  { %v2580_v41 = vadd.f32 %v3268_v53, %v4152_v63  ;;  %v2574_v22 = vpop.f32.mrb[35].mxu1 }
 0x8e7   :  { %v2575_v52 = vadd.f32 %v4152_v63, %v2574_v22 }
 0x8e8   :  { %v3518_v29 = vpop.eup %3517 }
 0x8e9   :  { %v2369_v27 = vadd.f32 1.0, %v3518_v29  ;;  %v3271_v26 = vpop.f32.mrb[36].mxu1  ;;  %2609 = vmax.xlane.f32.xlu0 %v2580_v41  ;;  %v3520_v32 = vpop.eup %3519 }
 0x8ea   :  { %v2584_v50 = vpop.f32.mrb[37].mxu1  ;;  %v2590_v55 = vadd.f32 %v3271_v26, %v4152_v63  ;;  %v2376_v56 = vadd.f32 1.0, %v3520_v32 }
 0x8eb   :  { %3521 = vrcp.f32 %v2369_v27  ;;  %v2585_v54 = vadd.f32 %v4152_v63, %v2584_v50 }
 0x8ec   :  { %3523 = vrcp.f32 %v2376_v56 }
 0x8ed   :  { %2611 = vmax.xlane.f32.xlu1 %v2585_v54  ;;  %2607 = vmax.xlane.f32.xlu0 %v2575_v52 }
 0x8f1   :  { %2613 = vmax.xlane.f32.xlu0 %v2590_v55 }
 0x8f5   :  { %v3522_v60 = vpop.eup %3521 }
 0x8f6   :  { %v2449_v61 = vmul.f32 %v3522_v60, %v2446_v23  ;;  %v3524_v5 = vpop.eup %3523 }
 0x8f7   :  { %v2452_v48 = vsub.f32 1.0, %v3524_v5  ;;  %v2454_v13 = vmul.f32 %v3524_v5, %v4120_v14 }
 0x8f8   :  { %v2450_v0 = vadd.f32 %v2449_v61, %v3895_v35 }
 0x8fa   :  { %3525 = vtanh.f32 %v2450_v0 }
 0x904   :  { %v3526_v34 = vpop.eup %3525 }
 0x905   :  { %v2453_v44 = vmul.f32 %v3526_v34, %v2452_v48 }
 0x907   :  { %v2455_v11 = vadd.f32 %v2454_v13, %v2453_v44 }
 0x909   :  { %v2462_v58 = vsel %vm2461_vm3, %v2455_v11, 0.0 }
 0x90a   :  { %3273 = vmatmul.mubr.msk.f32.gmra.mrb[38].mxu1 %vm528_vm4, %v2462_v58 }
 0x971   :  { %v2606_v3 = vpop.xlane.xlu1 %2605 }
 0x972   :  { %v2604_v2 = vpop.xlane.xlu0 %2603  ;;  %v4164_v30 = vsub.f32 %v2570_v47, %v2606_v3 }
 0x973   :  { %v4166_v35 = vsub.f32 %v2565_v8, %v2604_v2 }
 0x974   :  { %v2629_v45 = vmul.f32 1.442695, %v4164_v30 }
 0x975   :  { %v2627_v10 = vmul.f32 1.442695, %v4166_v35 }
 0x976   :  { %v2610_v36 = vpop.xlane.xlu0 %2609  ;;  %3527 = vpow2.f32 %v2629_v45 }
 0x977   :  { %v4169_v17 = vsub.f32 %v2580_v41, %v2610_v36  ;;  %3529 = vpow2.f32 %v2627_v10 }
 0x979   :  { %v2633_v16 = vmul.f32 1.442695, %v4169_v17 }
 0x97a   :  { %v2608_v4 = vpop.xlane.xlu0 %2607  ;;  %v2612_v39 = vpop.xlane.xlu1 %2611 }
 0x97b   :  { %v4172_v12 = vsub.f32 %v2575_v52, %v2608_v4  ;;  %v4177_v51 = vsub.f32 %v2585_v54, %v2612_v39  ;;  %3531 = vpow2.f32 %v2633_v16 }
 0x97d   :  { %v2631_v38 = vmul.f32 1.442695, %v4172_v12  ;;  %v2635_v62 = vmul.f32 1.442695, %v4177_v51 }
 0x97e   :  { %v2614_v14 = vpop.xlane.xlu0 %2613 }
 0x97f   :  { %v4175_v19 = vsub.f32 %v2590_v55, %v2614_v14  ;;  %3533 = vpow2.f32 %v2631_v38 }
 0x980   :  { %v3528_v7 = vpop.eup %3527 }
 0x981   :  { %v2637_v31 = vmul.f32 1.442695, %v4175_v19  ;;  %v3530_v6 = vpop.eup %3529 }
 0x983   :  { %3535 = vpow2.f32 %v2637_v31 }
 0x984   :  { %3537 = vpow2.f32 %v2635_v62 }
 0x985   :  { %v3532_v59 = vpop.eup %3531 }
 0x989   :  { %v3534_v28 = vpop.eup %3533 }
 0x98d   :  { %v3536_v1 = vpop.eup %3535 }
 0x98e   :  { %v3538_v18 = vpop.eup %3537 }
 0x9dd   :  { %v3274_v21 = vpop.f32.mrb[38].mxu1 }
 0x9de   :  { %v2600_v25 = vadd.f32 %v3274_v21, %v4152_v63  ;;  %v2594_v9 = vpop.f32.mrb[39].mxu1 }
 0x9df   :  { %v2595_v24 = vadd.f32 %v4152_v63, %v2594_v9 }
 0x9e0   :  { %2617 = vmax.xlane.f32.xlu0 %v2600_v25 }
 0x9e1   :  { %2615 = vmax.xlane.f32.xlu1 %v2595_v24 }
 0x9e4   :  { %2645 = vadd.xlane.f32.xlu0 %v3528_v7 }
 0x9e5   :  { %2643 = vadd.xlane.f32.xlu1 %v3530_v6 }
 0x9e8   :  { %2649 = vadd.xlane.f32.xlu0 %v3532_v59 }
 0x9e9   :  { %2647 = vadd.xlane.f32.xlu1 %v3534_v28 }
 0x9ec   :  { %2653 = vadd.xlane.f32.xlu0 %v3536_v1 }
 0x9ed   :  { %2651 = vadd.xlane.f32.xlu1 %v3538_v18 }
 0xa6d   :  { %v2618_v40 = vpop.xlane.xlu0 %2617 }
 0xa6e   :  { %v2626_v15 = vsub.f32 %v2600_v25, %v2618_v40  ;;  %v2616_v20 = vpop.xlane.xlu1 %2615 }
 0xa6f   :  { %v2625_v37 = vsub.f32 %v2595_v24, %v2616_v20 }
 0xa70   :  { %v2641_v63 = vmul.f32 1.442695, %v2626_v15 }
 0xa71   :  { %v2639_v46 = vmul.f32 1.442695, %v2625_v37  ;;  %v2646_v42 = vpop.xlane.xlu0 %2645 }
 0xa72   :  { %3539 = vpow2.f32 %v2641_v63  ;;  %v2644_v43 = vpop.xlane.xlu1 %2643 }
 0xa73   :  { %3541 = vpow2.f32 %v2639_v46 }
 0xa74   :  { %3543 = vlog2.f32 %v2646_v42 }
 0xa75   :  { %3545 = vlog2.f32 %v2644_v43  ;;  %v2650_v47 = vpop.xlane.xlu0 %2649 }
 0xa76   :  { %3547 = vlog2.f32 %v2650_v47  ;;  %v2648_v49 = vpop.xlane.xlu1 %2647 }
 0xa77   :  { %3549 = vlog2.f32 %v2648_v49 }
 0xa79   :  { %v2654_v57 = vpop.xlane.xlu0 %2653 }
 0xa7a   :  { %3551 = vlog2.f32 %v2654_v57  ;;  %v2652_v8 = vpop.xlane.xlu1 %2651 }
 0xa7b   :  { %3553 = vlog2.f32 %v2652_v8 }
 0xa7c   :  { %v3540_v53 = vpop.eup %3539 }
 0xa7d   :  { %v3542_v41 = vpop.eup %3541  ;;  %2657 = vadd.xlane.f32.xlu0 %v3540_v53 }
 0xa7e   :  { %v3544_v22 = vpop.eup %3543  ;;  %2655 = vadd.xlane.f32.xlu1 %v3542_v41 }
 0xa7f   :  { %v3546_v29 = vpop.eup %3545  ;;  %v2662_v27 = vmul.f32 0.6931472, %v3544_v22 }
 0xa80   :  { %v3548_v26 = vpop.eup %3547  ;;  %v2660_v50 = vmul.f32 0.6931472, %v3546_v29 }
 0xa81   :  { %v3550_v52 = vpop.eup %3549  ;;  %v2676_v54 = vsub.f32 %v4164_v30, %v2662_v27  ;;  %v2666_v32 = vmul.f32 0.6931472, %v3548_v26 }
 0xa82   :  { %v2675_v55 = vsub.f32 %v4166_v35, %v2660_v50  ;;  %v2664_v56 = vmul.f32 0.6931472, %v3550_v52 }
 0xa83   :  { %2684 = vst [vmem:[%s4231_s17 + $0x8] sm:$0xff] %v2676_v54  ;;  %v2678_v23 = vsub.f32 %v4169_v17, %v2666_v32 }
 0xa84   :  { %v3552_v60 = vpop.eup %3551  ;;  %2683 = vst [vmem:[%s4231_s17] sm:$0xff] %v2675_v55  ;;  %v2677_v61 = vsub.f32 %v4172_v12, %v2664_v56 }
 0xa85   :  { %v3554_v0 = vpop.eup %3553  ;;  %2686 = vst [vmem:[%s4231_s17 + $0x18] sm:$0xff] %v2678_v23  ;;  %v2670_v5 = vmul.f32 0.6931472, %v3552_v60 }
 0xa86   :  { %2685 = vst [vmem:[%s4231_s17 + $0x10] sm:$0xff] %v2677_v61  ;;  %v2668_v48 = vmul.f32 0.6931472, %v3554_v0 }
 0xa87   :  { %v2680_v34 = vsub.f32 %v4175_v19, %v2670_v5 }
 0xa88   :  { %v2679_v33 = vsub.f32 %v4177_v51, %v2668_v48 }
 0xa89   :  { %2688 = vst [vmem:[%s4231_s17 + $0x28] sm:$0xff] %v2680_v34 }
 0xa8a   :  { %2687 = vst [vmem:[%s4231_s17 + $0x20] sm:$0xff] %v2679_v33 }
 0xb0a   :  { %v2658_v44 = vpop.xlane.xlu0 %2657 }
 0xb0b   :  { %3555 = vlog2.f32 %v2658_v44  ;;  %v2656_v13 = vpop.xlane.xlu1 %2655 }
 0xb0c   :  { %3557 = vlog2.f32 %v2656_v13 }
 0xb15   :  { %v3556_v11 = vpop.eup %3555 }
 0xb16   :  { %v3558_v58 = vpop.eup %3557  ;;  %v2674_v2 = vmul.f32 0.6931472, %v3556_v11 }
 0xb17   :  { %v2672_v36 = vmul.f32 0.6931472, %v3558_v58 }
 0xb18   :  { %v2682_v3 = vsub.f32 %v2626_v15, %v2674_v2 }
 0xb19   :  { %v2681_v4 = vsub.f32 %v2625_v37, %v2672_v36 }
 0xb1a   :  { %2690 = vst [vmem:[%s4231_s17 + $0x38] sm:$0xff] %v2682_v3 }
 0xb1b   :  { %2689 = vst [vmem:[%s4231_s17 + $0x30] sm:$0xff] %v2681_v4 }

</bundles_post_ra>
